<compile_context>
chip_gen: v7x
topology: tpu7x:2x2x1
jax: 0.10.0
libtpu: 0.0.40
codegen_flags: <defaults>
</compile_context>

<pallas_src>
import functools

import jax
import jax.numpy as jnp
from jax import lax
from jax.experimental import pallas as pl
from jax.experimental.pallas import tpu as pltpu

NEG_SLOPE = 0.2
BN_EPS = 1e-5
UP_SIZE = 512
UP_ROW_TILE = 128
KH = KW = 4
STRIDE = 2
PAD = 1
MAX_M_TILE = 512


def _round_up(v, m):
    return (v + m - 1) // m * m


# ------------------------------------------------------------------ kernels

def _convT_kernel(colT_ref, w_ref, b_ref, y_ref):
    """y^T tile = W2d @ colT tile + b :  (Cout,K)@(K,TM) -> (Cout,TM), lane-dense."""
    acc = jnp.dot(w_ref[...], colT_ref[...], preferred_element_type=jnp.float32)
    y_ref[...] = (acc + b_ref[...]).astype(y_ref.dtype)


def _convT_stats_kernel(colT_ref, w_ref, b_ref, y_ref, sum_ref, ssq_ref, *, tm, m_true):
    """Conv tile + per-tile BatchNorm partial statistics (sum, sum of squares)."""
    acc = jnp.dot(w_ref[...], colT_ref[...], preferred_element_type=jnp.float32)
    y = acc + b_ref[...]                                    # (Cout, TM) f32
    y_ref[...] = y.astype(y_ref.dtype)
    # Mask out padded pixel columns (M was rounded up to a multiple of TM).
    lane = pl.program_id(0) * tm + lax.broadcasted_iota(jnp.int32, y.shape, 1)
    yv = jnp.where(lane < m_true, y, 0.0)
    sum_ref[0] = jnp.sum(yv, axis=1, keepdims=True)         # (Cout, 1)
    ssq_ref[0] = jnp.sum(yv * yv, axis=1, keepdims=True)    # (Cout, 1)


def _upsample_sigmoid_kernel(x_ref, ly_ref, lxt_ref, o_ref):
    """One (row-tile x 512) slab of bilinear upsample + sigmoid for one image."""
    x = x_ref[0]                                                       # (H3, W3) f32
    t = jnp.dot(ly_ref[...], x, preferred_element_type=jnp.float32)    # (TS, W3)
    y = jnp.dot(t, lxt_ref[...], preferred_element_type=jnp.float32)   # (TS, 512)
    o_ref[0] = jax.nn.sigmoid(y)


# ----------------------------------------------------------------- wrappers

def convT(colT, w2d, bias, *, with_stats, out_dtype):
    """colT: (K, M) bf16, w2d: (Cout, K) bf16, bias: (Cout,) f32.
    Returns y^T (Cout, Mp) [+ per-tile BN partial sums/sumsq]."""
    K, M = colT.shape
    Cout = w2d.shape[0]
    TM = MAX_M_TILE if M >= MAX_M_TILE else _round_up(M, 128)
    Mp = _round_up(M, TM)
    if Mp != M:
        colT = jnp.pad(colT, ((0, 0), (0, Mp - M)))
    nt = Mp // TM
    b2 = bias.astype(jnp.float32).reshape(Cout, 1)

    in_specs = [
        pl.BlockSpec((K, TM), lambda i: (0, i)),        # streamed pixel tiles
        pl.BlockSpec((Cout, K), lambda i: (0, 0)),      # weights resident
        pl.BlockSpec((Cout, 1), lambda i: (0, 0)),      # bias resident
    ]
    y_spec = pl.BlockSpec((Cout, TM), lambda i: (0, i))
    cparams = pltpu.CompilerParams(dimension_semantics=("parallel",))

    if with_stats:
        kern = functools.partial(_convT_stats_kernel, tm=TM, m_true=M)
        out_shape = (
            jax.ShapeDtypeStruct((Cout, Mp), out_dtype),
            jax.ShapeDtypeStruct((nt, Cout, 1), jnp.float32),
            jax.ShapeDtypeStruct((nt, Cout, 1), jnp.float32),
        )
        out_specs = (
            y_spec,
            pl.BlockSpec((1, Cout, 1), lambda i: (i, 0, 0)),
            pl.BlockSpec((1, Cout, 1), lambda i: (i, 0, 0)),
        )
        return pl.pallas_call(kern, out_shape=out_shape, grid=(nt,),
                              in_specs=in_specs, out_specs=out_specs,
                              compiler_params=cparams)(colT, w2d, b2)

    return pl.pallas_call(_convT_kernel,
                          out_shape=jax.ShapeDtypeStruct((Cout, Mp), out_dtype),
                          grid=(nt,), in_specs=in_specs, out_specs=y_spec,
                          compiler_params=cparams)(colT, w2d, b2)


def upsample_sigmoid(x3, ly, lxt):
    """x3: (N, H3, W3) f32 -> (N, 512, 512) bilinear upsample + sigmoid, row-tiled."""
    N, H3, W3 = x3.shape
    S = ly.shape[0]
    TS = UP_ROW_TILE
    return pl.pallas_call(
        _upsample_sigmoid_kernel,
        out_shape=jax.ShapeDtypeStruct((N, S, S), jnp.float32),
        grid=(N, S // TS),
        in_specs=[
            pl.BlockSpec((1, H3, W3), lambda n, r: (n, 0, 0)),
            pl.BlockSpec((TS, H3), lambda n, r: (r, 0)),
            pl.BlockSpec((W3, S), lambda n, r: (0, 0)),
        ],
        out_specs=pl.BlockSpec((1, TS, S), lambda n, r: (n, r, 0)),
        compiler_params=pltpu.CompilerParams(
            dimension_semantics=("parallel", "parallel")),
    )(x3, ly, lxt)


# --------------------------------------------------------------------- glue

def im2colT(a):
    """a: channel-major (C, N, H, W) -> colT (C*KH*KW, N*Ho*Wo) for k=4, s=2, p=1.

    K ordering is (c, ky, kx), matching w.reshape(Cout, Cin*KH*KW).  The zero-padding
    happens here, i.e. *after* the previous layer's BN+LeakyReLU (PyTorch semantics).
    """
    C, N, H, W = a.shape
    ap = jnp.pad(a, ((0, 0), (0, 0), (PAD, PAD), (PAD, PAD)))
    Ho = (H + 2 * PAD - KH) // STRIDE + 1
    Wo = (W + 2 * PAD - KW) // STRIDE + 1
    taps = []
    for ky in range(KH):
        for kx in range(KW):
            taps.append(ap[:, :,
                           ky:ky + STRIDE * (Ho - 1) + 1:STRIDE,
                           kx:kx + STRIDE * (Wo - 1) + 1:STRIDE])   # (C, N, Ho, Wo)
    colT = jnp.stack(taps, axis=1)                                  # (C, KH*KW, N, Ho, Wo)
    return colT.reshape(C * KH * KW, N * Ho * Wo), Ho, Wo


def bn_scale_shift(part_sums, part_ssqs, m, gamma, beta):
    """Fold training-mode BatchNorm (biased batch variance) into per-channel scale/shift."""
    s = jnp.sum(part_sums, axis=0)[:, 0]
    ss = jnp.sum(part_ssqs, axis=0)[:, 0]
    mean = s / m
    # E[x^2] - E[x]^2 in f32; fine at these sizes.
    # TODO(synk): switch to a shifted / two-pass formulation if M reaches ~1e6.
    var = jnp.maximum(ss / m - mean * mean, 0.0)
    scale = gamma * lax.rsqrt(var + BN_EPS)
    shift = beta - mean * scale
    return scale, shift


def bn_leaky_apply(y_t, scale, shift, n, h, w):
    """Per-channel scale/shift + LeakyReLU(0.2); XLA fuses this into the next im2colT."""
    c = scale.shape[0]
    m = n * h * w
    y = y_t[:, :m].astype(jnp.float32)
    z = y * scale[:, None] + shift[:, None]
    z = jnp.where(z >= 0, z, NEG_SLOPE * z)
    return z.reshape(c, n, h, w).astype(jnp.bfloat16)


def bilinear_matrix(in_size, out_size):
    """Interpolation matrix L (out_size, in_size), align_corners=False semantics."""
    scale = in_size / out_size
    src = (jnp.arange(out_size, dtype=jnp.float32) + 0.5) * scale - 0.5
    src = jnp.maximum(src, 0.0)  # PyTorch clamps negative source coords
    i0 = jnp.clip(jnp.floor(src).astype(jnp.int32), 0, in_size - 1)
    i1 = jnp.minimum(i0 + 1, in_size - 1)
    lam = src - i0.astype(jnp.float32)
    w0 = jax.nn.one_hot(i0, in_size, dtype=jnp.float32) * (1.0 - lam)[:, None]
    w1 = jax.nn.one_hot(i1, in_size, dtype=jnp.float32) * lam[:, None]
    return w0 + w1


def init_params(key, num_classes, ndf=32):
    ks = jax.random.split(key, 10)

    def conv_wb(kw_, kb_, cin, cout):
        fan_in = cin * KH * KW
        bound = 1.0 / jnp.sqrt(fan_in)
        w = jax.random.uniform(kw_, (cout, cin, KH, KW), jnp.float32, -bound, bound)
        b = jax.random.uniform(kb_, (cout,), jnp.float32, -bound, bound)
        # (Cout, Cin*KH*KW): K ordering (c, ky, kx), matching im2colT.
        return w.reshape(cout, cin * KH * KW), b

    w1, b1 = conv_wb(ks[0], ks[1], num_classes, ndf)
    w2, b2 = conv_wb(ks[2], ks[3], ndf, ndf * 2)
    wc, bc = conv_wb(ks[4], ks[5], ndf * 2, 1)
    g1 = 1.0 + 0.1 * jax.random.normal(ks[6], (ndf,), jnp.float32)
    be1 = 0.1 * jax.random.normal(ks[7], (ndf,), jnp.float32)
    g2 = 1.0 + 0.1 * jax.random.normal(ks[8], (ndf * 2,), jnp.float32)
    be2 = 0.1 * jax.random.normal(ks[9], (ndf * 2,), jnp.float32)
    return dict(w1=w1, b1=b1, g1=g1, be1=be1,
                w2=w2, b2=b2, g2=g2, be2=be2,
                wc=wc, bc=bc)


def fc_discriminator_forward(x, params):
    # ReverseLayerF.apply(x, alpha=0.9) is identity in the forward pass.
    N = x.shape[0]

    # Channel-major activations (C, N, H, W); bf16 feeds the MXU, f32 accumulation.
    a0 = jnp.transpose(x, (1, 0, 2, 3)).astype(jnp.bfloat16)

    # conv1 (+ in-kernel BN partial stats) -> BN+LeakyReLU folded into next im2col.
    colT1, H1, W1 = im2colT(a0)
    y1, s1, q1 = convT(colT1, params["w1"].astype(jnp.bfloat16), params["b1"],
                       with_stats=True, out_dtype=jnp.bfloat16)
    sc1, sh1 = bn_scale_shift(s1, q1, N * H1 * W1, params["g1"], params["be1"])
    a1 = bn_leaky_apply(y1, sc1, sh1, N, H1, W1)                # (ndf, N, H1, W1)

    # conv2 (+ in-kernel BN partial stats)
    colT2, H2, W2 = im2colT(a1)
    y2, s2, q2 = convT(colT2, params["w2"].astype(jnp.bfloat16), params["b2"],
                       with_stats=True, out_dtype=jnp.bfloat16)
    sc2, sh2 = bn_scale_shift(s2, q2, N * H2 * W2, params["g2"], params["be2"])
    a2 = bn_leaky_apply(y2, sc2, sh2, N, H2, W2)                # (2*ndf, N, H2, W2)

    # classifier conv: lane-dense (1, M3) row vector (tiny intermediate).
    colT3, H3, W3 = im2colT(a2)
    y3 = convT(colT3, params["wc"].astype(jnp.bfloat16), params["bc"],
               with_stats=False, out_dtype=jnp.float32)
    x3 = y3[:, :N * H3 * W3].reshape(N, H3, W3)

    # Bilinear upsample to 512x512 (align_corners=False) + sigmoid, row-tiled.
    ly = bilinear_matrix(H3, UP_SIZE)
    lxt = bilinear_matrix(W3, UP_SIZE).T
    out = upsample_sigmoid(x3, ly, lxt)
    return out.reshape(N, 1, UP_SIZE, UP_SIZE)


if __name__ == "__main__":
    num_classes, ndf = 4, 32
    N, H, W = 2, 16, 16

    key = jax.random.PRNGKey(0)
    k_x, k_p = jax.random.split(key)
    x = jax.random.normal(k_x, (N, num_classes, H, W), jnp.float32)
    params = init_params(k_p, num_classes, ndf)

    out = jax.jit(fc_discriminator_forward)(x, params)
    out = jax.block_until_ready(out)

    assert out.shape == (N, 1, UP_SIZE, UP_SIZE), out.shape
    assert bool(jnp.all(jnp.isfinite(out)))
    assert bool(jnp.all((out >= 0.0) & (out <= 1.0)))  # sigmoid output range
    print("KERNEL_OK")
</pallas_src>

<mosaic_0001>
module attributes {stable_mosaic.version = 11 : i64} {
  func.func @_convT_stats_kernel(%arg0: i32, %arg1: memref<64x128xbf16, #tpu.memory_space<vmem>>, %arg2: memref<32x64xbf16, #tpu.memory_space<vmem>>, %arg3: memref<32x1xf32, #tpu.memory_space<vmem>>, %arg4: memref<32x128xbf16, #tpu.memory_space<vmem>>, %arg5: memref<1x32x1xf32, #tpu.memory_space<vmem>>, %arg6: memref<1x32x1xf32, #tpu.memory_space<vmem>>) attributes {dimension_semantics = [#tpu.dimension_semantics<parallel>], iteration_bounds = array<i64: 1>, scalar_prefetch = 0 : i64, scratch_operands = 0 : i64, tpu.core_type = #tpu.core_type<tc>, window_params = [{transform_indices = @transform_0, window_bounds = array<i64: 64, 128>}, {pipeline_mode = #tpu.pipeline_mode<synchronous>, transform_indices = @transform_1, window_bounds = array<i64: 32, 64>}, {pipeline_mode = #tpu.pipeline_mode<synchronous>, transform_indices = @transform_2, window_bounds = array<i64: 32, 1>}, {transform_indices = @transform_3, window_bounds = array<i64: 32, 128>}, {transform_indices = @transform_4, window_bounds = array<i64: 1, 32, 1>}, {transform_indices = @transform_5, window_bounds = array<i64: 1, 32, 1>}]} {
    %c0 = arith.constant 0 : index
    %c0_0 = arith.constant 0 : index
    %0 = vector.load %arg2[%c0, %c0_0] : memref<32x64xbf16, #tpu.memory_space<vmem>>, vector<32x64xbf16>
    %c0_1 = arith.constant 0 : index
    %c0_2 = arith.constant 0 : index
    %1 = vector.load %arg1[%c0_1, %c0_2] : memref<64x128xbf16, #tpu.memory_space<vmem>>, vector<64x128xbf16>
    %cst = arith.constant dense<0.000000e+00> : vector<32x128xf32>
    %2 = tpu.matmul %0, %1, %cst {dimension_numbers = #tpu.dot_dimension_numbers<[1], [0], [0], [1], [0, 0, 1, 1], [], []>} : vector<32x64xbf16>, vector<64x128xbf16>, vector<32x128xf32> -> vector<32x128xf32>
    %c0_3 = arith.constant 0 : index
    %c0_4 = arith.constant 0 : index
    %3 = vector.load %arg3[%c0_3, %c0_4] : memref<32x1xf32, #tpu.memory_space<vmem>>, vector<32x1xf32>
    %4 = vector.broadcast %3 : vector<32x1xf32> to vector<32x128xf32>
    %5 = arith.addf %2, %4 : vector<32x128xf32>
    %6 = arith.truncf %5 : vector<32x128xf32> to vector<32x128xbf16>
    %c0_5 = arith.constant 0 : index
    %c0_6 = arith.constant 0 : index
    %7 = vector.load %arg4[%c0_5, %c0_6] : memref<32x128xbf16, #tpu.memory_space<vmem>>, vector<32x128xbf16>
    tpu.vector_store %arg4[%c0_5, %c0_6], %6 {strides = array<i32>} : memref<32x128xbf16, #tpu.memory_space<vmem>>, vector<32x128xbf16>,
    %c128_i32 = arith.constant 128 : i32
    %8 = arith.muli %arg0, %c128_i32 : i32
    %9 = tpu.iota {dimensions = array<i32: 1>} : vector<32x128xi32>
    %10 = vector.broadcast %8 : i32 to vector<32x128xi32>
    %11 = arith.addi %10, %9 : vector<32x128xi32>
    %c128_i32_7 = arith.constant 128 : i32
    %12 = vector.broadcast %c128_i32_7 : i32 to vector<32x128xi32>
    %13 = arith.cmpi slt, %11, %12 : vector<32x128xi32>
    %cst_8 = arith.constant 0.000000e+00 : f32
    %14 = vector.broadcast %cst_8 : f32 to vector<32x128xf32>
    %15 = arith.select %13, %5, %14 : vector<32x128xi1>, vector<32x128xf32>
    %cst_9 = arith.constant dense<0.000000e+00> : vector<32xf32>
    %16 = vector.multi_reduction <add>, %15, %cst_9 [1] : vector<32x128xf32> to vector<32xf32>
    %17 = vector.shape_cast %16 : vector<32xf32> to vector<32x1xf32>
    %c0_10 = arith.constant 0 : index
    %c0_11 = arith.constant 0 : index
    %c0_12 = arith.constant 0 : index
    %18 = vector.load %arg5[%c0_10, %c0_11, %c0_12] : memref<1x32x1xf32, #tpu.memory_space<vmem>>, vector<1x32x1xf32>
    %19 = vector.shape_cast %18 : vector<1x32x1xf32> to vector<32x1xf32>
    %20 = vector.shape_cast %17 : vector<32x1xf32> to vector<1x32x1xf32>
    tpu.vector_store %arg5[%c0_10, %c0_11, %c0_12], %20 {strides = array<i32>} : memref<1x32x1xf32, #tpu.memory_space<vmem>>, vector<1x32x1xf32>,
    %21 = arith.mulf %15, %15 : vector<32x128xf32>
    %cst_13 = arith.constant dense<0.000000e+00> : vector<32xf32>
    %22 = vector.multi_reduction <add>, %21, %cst_13 [1] : vector<32x128xf32> to vector<32xf32>
    %23 = vector.shape_cast %22 : vector<32xf32> to vector<32x1xf32>
    %c0_14 = arith.constant 0 : index
    %c0_15 = arith.constant 0 : index
    %c0_16 = arith.constant 0 : index
    %24 = vector.load %arg6[%c0_14, %c0_15, %c0_16] : memref<1x32x1xf32, #tpu.memory_space<vmem>>, vector<1x32x1xf32>
    %25 = vector.shape_cast %24 : vector<1x32x1xf32> to vector<32x1xf32>
    %26 = vector.shape_cast %23 : vector<32x1xf32> to vector<1x32x1xf32>
    tpu.vector_store %arg6[%c0_14, %c0_15, %c0_16], %26 {strides = array<i32>} : memref<1x32x1xf32, #tpu.memory_space<vmem>>, vector<1x32x1xf32>,
    return
  }
  func.func @transform_0(%arg0: i32) -> (i32, i32) {
    %c0_i32 = arith.constant 0 : i32
    %c0_i32_0 = arith.constant 0 : i32
    return %c0_i32, %arg0 : i32, i32
  }
  func.func @transform_1(%arg0: i32) -> (i32, i32) {
    %c0_i32 = arith.constant 0 : i32
    %c0_i32_0 = arith.constant 0 : i32
    %c0_i32_1 = arith.constant 0 : i32
    return %c0_i32, %c0_i32_0 : i32, i32
  }
  func.func @transform_2(%arg0: i32) -> (i32, i32) {
    %c0_i32 = arith.constant 0 : i32
    %c0_i32_0 = arith.constant 0 : i32
    %c0_i32_1 = arith.constant 0 : i32
    return %c0_i32, %c0_i32_0 : i32, i32
  }
  func.func @transform_3(%arg0: i32) -> (i32, i32) {
    %c0_i32 = arith.constant 0 : i32
    %c0_i32_0 = arith.constant 0 : i32
    return %c0_i32, %arg0 : i32, i32
  }
  func.func @transform_4(%arg0: i32) -> (i32, i32, i32) {
    %c0_i32 = arith.constant 0 : i32
    %c0_i32_0 = arith.constant 0 : i32
    %c0_i32_1 = arith.constant 0 : i32
    return %arg0, %c0_i32, %c0_i32_0 : i32, i32, i32
  }
  func.func @transform_5(%arg0: i32) -> (i32, i32, i32) {
    %c0_i32 = arith.constant 0 : i32
    %c0_i32_0 = arith.constant 0 : i32
    %c0_i32_1 = arith.constant 0 : i32
    return %arg0, %c0_i32, %c0_i32_0 : i32, i32, i32
  }
}

module attributes {stable_mosaic.version = 11 : i64} {
  func.func @_convT_stats_kernel(%arg0: i32, %arg1: memref<512x128xbf16, #tpu.memory_space<vmem>>, %arg2: memref<64x512xbf16, #tpu.memory_space<vmem>>, %arg3: memref<64x1xf32, #tpu.memory_space<vmem>>, %arg4: memref<64x128xbf16, #tpu.memory_space<vmem>>, %arg5: memref<1x64x1xf32, #tpu.memory_space<vmem>>, %arg6: memref<1x64x1xf32, #tpu.memory_space<vmem>>) attributes {dimension_semantics = [#tpu.dimension_semantics<parallel>], iteration_bounds = array<i64: 1>, scalar_prefetch = 0 : i64, scratch_operands = 0 : i64, tpu.core_type = #tpu.core_type<tc>, window_params = [{transform_indices = @transform_0, window_bounds = array<i64: 512, 128>}, {pipeline_mode = #tpu.pipeline_mode<synchronous>, transform_indices = @transform_1, window_bounds = array<i64: 64, 512>}, {pipeline_mode = #tpu.pipeline_mode<synchronous>, transform_indices = @transform_2, window_bounds = array<i64: 64, 1>}, {transform_indices = @transform_3, window_bounds = array<i64: 64, 128>}, {transform_indices = @transform_4, window_bounds = array<i64: 1, 64, 1>}, {transform_indices = @transform_5, window_bounds = array<i64: 1, 64, 1>}]} {
    %c0 = arith.constant 0 : index
    %c0_0 = arith.constant 0 : index
    %0 = vector.load %arg2[%c0, %c0_0] : memref<64x512xbf16, #tpu.memory_space<vmem>>, vector<64x512xbf16>
    %c0_1 = arith.constant 0 : index
    %c0_2 = arith.constant 0 : index
    %1 = vector.load %arg1[%c0_1, %c0_2] : memref<512x128xbf16, #tpu.memory_space<vmem>>, vector<512x128xbf16>
    %cst = arith.constant dense<0.000000e+00> : vector<64x128xf32>
    %2 = tpu.matmul %0, %1, %cst {dimension_numbers = #tpu.dot_dimension_numbers<[1], [0], [0], [1], [0, 0, 1, 1], [], []>} : vector<64x512xbf16>, vector<512x128xbf16>, vector<64x128xf32> -> vector<64x128xf32>
    %c0_3 = arith.constant 0 : index
    %c0_4 = arith.constant 0 : index
    %3 = vector.load %arg3[%c0_3, %c0_4] : memref<64x1xf32, #tpu.memory_space<vmem>>, vector<64x1xf32>
    %4 = vector.broadcast %3 : vector<64x1xf32> to vector<64x128xf32>
    %5 = arith.addf %2, %4 : vector<64x128xf32>
    %6 = arith.truncf %5 : vector<64x128xf32> to vector<64x128xbf16>
    %c0_5 = arith.constant 0 : index
    %c0_6 = arith.constant 0 : index
    %7 = vector.load %arg4[%c0_5, %c0_6] : memref<64x128xbf16, #tpu.memory_space<vmem>>, vector<64x128xbf16>
    tpu.vector_store %arg4[%c0_5, %c0_6], %6 {strides = array<i32>} : memref<64x128xbf16, #tpu.memory_space<vmem>>, vector<64x128xbf16>,
    %c128_i32 = arith.constant 128 : i32
    %8 = arith.muli %arg0, %c128_i32 : i32
    %9 = tpu.iota {dimensions = array<i32: 1>} : vector<64x128xi32>
    %10 = vector.broadcast %8 : i32 to vector<64x128xi32>
    %11 = arith.addi %10, %9 : vector<64x128xi32>
    %c32_i32 = arith.constant 32 : i32
    %12 = vector.broadcast %c32_i32 : i32 to vector<64x128xi32>
    %13 = arith.cmpi slt, %11, %12 : vector<64x128xi32>
    %cst_7 = arith.constant 0.000000e+00 : f32
    %14 = vector.broadcast %cst_7 : f32 to vector<64x128xf32>
    %15 = arith.select %13, %5, %14 : vector<64x128xi1>, vector<64x128xf32>
    %cst_8 = arith.constant dense<0.000000e+00> : vector<64xf32>
    %16 = vector.multi_reduction <add>, %15, %cst_8 [1] : vector<64x128xf32> to vector<64xf32>
    %17 = vector.shape_cast %16 : vector<64xf32> to vector<64x1xf32>
    %c0_9 = arith.constant 0 : index
    %c0_10 = arith.constant 0 : index
    %c0_11 = arith.constant 0 : index
    %18 = vector.load %arg5[%c0_9, %c0_10, %c0_11] : memref<1x64x1xf32, #tpu.memory_space<vmem>>, vector<1x64x1xf32>
    %19 = vector.shape_cast %18 : vector<1x64x1xf32> to vector<64x1xf32>
    %20 = vector.shape_cast %17 : vector<64x1xf32> to vector<1x64x1xf32>
    tpu.vector_store %arg5[%c0_9, %c0_10, %c0_11], %20 {strides = array<i32>} : memref<1x64x1xf32, #tpu.memory_space<vmem>>, vector<1x64x1xf32>,
    %21 = arith.mulf %15, %15 : vector<64x128xf32>
    %cst_12 = arith.constant dense<0.000000e+00> : vector<64xf32>
    %22 = vector.multi_reduction <add>, %21, %cst_12 [1] : vector<64x128xf32> to vector<64xf32>
    %23 = vector.shape_cast %22 : vector<64xf32> to vector<64x1xf32>
    %c0_13 = arith.constant 0 : index
    %c0_14 = arith.constant 0 : index
    %c0_15 = arith.constant 0 : index
    %24 = vector.load %arg6[%c0_13, %c0_14, %c0_15] : memref<1x64x1xf32, #tpu.memory_space<vmem>>, vector<1x64x1xf32>
    %25 = vector.shape_cast %24 : vector<1x64x1xf32> to vector<64x1xf32>
    %26 = vector.shape_cast %23 : vector<64x1xf32> to vector<1x64x1xf32>
    tpu.vector_store %arg6[%c0_13, %c0_14, %c0_15], %26 {strides = array<i32>} : memref<1x64x1xf32, #tpu.memory_space<vmem>>, vector<1x64x1xf32>,
    return
  }
  func.func @transform_0(%arg0: i32) -> (i32, i32) {
    %c0_i32 = arith.constant 0 : i32
    %c0_i32_0 = arith.constant 0 : i32
    return %c0_i32, %arg0 : i32, i32
  }
  func.func @transform_1(%arg0: i32) -> (i32, i32) {
    %c0_i32 = arith.constant 0 : i32
    %c0_i32_0 = arith.constant 0 : i32
    %c0_i32_1 = arith.constant 0 : i32
    return %c0_i32, %c0_i32_0 : i32, i32
  }
  func.func @transform_2(%arg0: i32) -> (i32, i32) {
    %c0_i32 = arith.constant 0 : i32
    %c0_i32_0 = arith.constant 0 : i32
    %c0_i32_1 = arith.constant 0 : i32
    return %c0_i32, %c0_i32_0 : i32, i32
  }
  func.func @transform_3(%arg0: i32) -> (i32, i32) {
    %c0_i32 = arith.constant 0 : i32
    %c0_i32_0 = arith.constant 0 : i32
    return %c0_i32, %arg0 : i32, i32
  }
  func.func @transform_4(%arg0: i32) -> (i32, i32, i32) {
    %c0_i32 = arith.constant 0 : i32
    %c0_i32_0 = arith.constant 0 : i32
    %c0_i32_1 = arith.constant 0 : i32
    return %arg0, %c0_i32, %c0_i32_0 : i32, i32, i32
  }
  func.func @transform_5(%arg0: i32) -> (i32, i32, i32) {
    %c0_i32 = arith.constant 0 : i32
    %c0_i32_0 = arith.constant 0 : i32
    %c0_i32_1 = arith.constant 0 : i32
    return %arg0, %c0_i32, %c0_i32_0 : i32, i32, i32
  }
}

module attributes {stable_mosaic.version = 11 : i64} {
  func.func @_convT_kernel(%arg0: i32, %arg1: memref<1024x128xbf16, #tpu.memory_space<vmem>>, %arg2: memref<1x1024xbf16, #tpu.memory_space<vmem>>, %arg3: memref<1x1xf32, #tpu.memory_space<vmem>>, %arg4: memref<1x128xf32, #tpu.memory_space<vmem>>) attributes {dimension_semantics = [#tpu.dimension_semantics<parallel>], iteration_bounds = array<i64: 1>, scalar_prefetch = 0 : i64, scratch_operands = 0 : i64, tpu.core_type = #tpu.core_type<tc>, window_params = [{transform_indices = @transform_0, window_bounds = array<i64: 1024, 128>}, {pipeline_mode = #tpu.pipeline_mode<synchronous>, transform_indices = @transform_1, window_bounds = array<i64: 1, 1024>}, {pipeline_mode = #tpu.pipeline_mode<synchronous>, transform_indices = @transform_2, window_bounds = array<i64: 1, 1>}, {transform_indices = @transform_3, window_bounds = array<i64: 1, 128>}]} {
    %c0 = arith.constant 0 : index
    %c0_0 = arith.constant 0 : index
    %0 = vector.load %arg2[%c0, %c0_0] : memref<1x1024xbf16, #tpu.memory_space<vmem>>, vector<1x1024xbf16>
    %c0_1 = arith.constant 0 : index
    %c0_2 = arith.constant 0 : index
    %1 = vector.load %arg1[%c0_1, %c0_2] : memref<1024x128xbf16, #tpu.memory_space<vmem>>, vector<1024x128xbf16>
    %cst = arith.constant dense<0.000000e+00> : vector<1x128xf32>
    %2 = tpu.matmul %0, %1, %cst {dimension_numbers = #tpu.dot_dimension_numbers<[1], [0], [0], [1], [0, 0, 1, 1], [], []>} : vector<1x1024xbf16>, vector<1024x128xbf16>, vector<1x128xf32> -> vector<1x128xf32>
    %c0_3 = arith.constant 0 : index
    %c0_4 = arith.constant 0 : index
    %3 = vector.load %arg3[%c0_3, %c0_4] : memref<1x1xf32, #tpu.memory_space<vmem>>, vector<1x1xf32>
    %4 = vector.broadcast %3 : vector<1x1xf32> to vector<1x128xf32>
    %5 = arith.addf %2, %4 : vector<1x128xf32>
    %c0_5 = arith.constant 0 : index
    %c0_6 = arith.constant 0 : index
    %6 = vector.load %arg4[%c0_5, %c0_6] : memref<1x128xf32, #tpu.memory_space<vmem>>, vector<1x128xf32>
    tpu.vector_store %arg4[%c0_5, %c0_6], %5 {strides = array<i32>} : memref<1x128xf32, #tpu.memory_space<vmem>>, vector<1x128xf32>,
    return
  }
  func.func @transform_0(%arg0: i32) -> (i32, i32) {
    %c0_i32 = arith.constant 0 : i32
    %c0_i32_0 = arith.constant 0 : i32
    return %c0_i32, %arg0 : i32, i32
  }
  func.func @transform_1(%arg0: i32) -> (i32, i32) {
    %c0_i32 = arith.constant 0 : i32
    %c0_i32_0 = arith.constant 0 : i32
    %c0_i32_1 = arith.constant 0 : i32
    return %c0_i32, %c0_i32_0 : i32, i32
  }
  func.func @transform_2(%arg0: i32) -> (i32, i32) {
    %c0_i32 = arith.constant 0 : i32
    %c0_i32_0 = arith.constant 0 : i32
    %c0_i32_1 = arith.constant 0 : i32
    return %c0_i32, %c0_i32_0 : i32, i32
  }
  func.func @transform_3(%arg0: i32) -> (i32, i32) {
    %c0_i32 = arith.constant 0 : i32
    %c0_i32_0 = arith.constant 0 : i32
    return %c0_i32, %arg0 : i32, i32
  }
}

module attributes {stable_mosaic.version = 11 : i64} {
  func.func @_upsample_sigmoid_kernel(%arg0: i32, %arg1: i32, %arg2: memref<1x2x2xf32, #tpu.memory_space<vmem>>, %arg3: memref<128x2xf32, #tpu.memory_space<vmem>>, %arg4: memref<2x512xf32, #tpu.memory_space<vmem>>, %arg5: memref<1x128x512xf32, #tpu.memory_space<vmem>>) attributes {dimension_semantics = [#tpu.dimension_semantics<parallel>, #tpu.dimension_semantics<parallel>], iteration_bounds = array<i64: 2, 4>, scalar_prefetch = 0 : i64, scratch_operands = 0 : i64, tpu.core_type = #tpu.core_type<tc>, window_params = [{transform_indices = @transform_0, window_bounds = array<i64: 1, 2, 2>}, {transform_indices = @transform_1, window_bounds = array<i64: 128, 2>}, {pipeline_mode = #tpu.pipeline_mode<synchronous>, transform_indices = @transform_2, window_bounds = array<i64: 2, 512>}, {transform_indices = @transform_3, window_bounds = array<i64: 1, 128, 512>}]} {
    %c0 = arith.constant 0 : index
    %c0_0 = arith.constant 0 : index
    %c0_1 = arith.constant 0 : index
    %0 = vector.load %arg2[%c0, %c0_0, %c0_1] : memref<1x2x2xf32, #tpu.memory_space<vmem>>, vector<1x2x2xf32>
    %1 = vector.shape_cast %0 : vector<1x2x2xf32> to vector<2x2xf32>
    %c0_2 = arith.constant 0 : index
    %c0_3 = arith.constant 0 : index
    %2 = vector.load %arg3[%c0_2, %c0_3] : memref<128x2xf32, #tpu.memory_space<vmem>>, vector<128x2xf32>
    %cst = arith.constant dense<0.000000e+00> : vector<128x2xf32>
    %3 = tpu.matmul %2, %1, %cst {dimension_numbers = #tpu.dot_dimension_numbers<[1], [0], [0], [1], [0, 0, 1, 1], [], []>} : vector<128x2xf32>, vector<2x2xf32>, vector<128x2xf32> -> vector<128x2xf32>
    %c0_4 = arith.constant 0 : index
    %c0_5 = arith.constant 0 : index
    %4 = vector.load %arg4[%c0_4, %c0_5] : memref<2x512xf32, #tpu.memory_space<vmem>>, vector<2x512xf32>
    %cst_6 = arith.constant dense<0.000000e+00> : vector<128x512xf32>
    %5 = tpu.matmul %3, %4, %cst_6 {dimension_numbers = #tpu.dot_dimension_numbers<[1], [0], [0], [1], [0, 0, 1, 1], [], []>} : vector<128x2xf32>, vector<2x512xf32>, vector<128x512xf32> -> vector<128x512xf32>
    %6 = arith.negf %5 : vector<128x512xf32>
    %7 = math.exp %6 : vector<128x512xf32>
    %cst_7 = arith.constant 1.000000e+00 : f32
    %8 = vector.broadcast %cst_7 : f32 to vector<128x512xf32>
    %9 = arith.addf %8, %7 : vector<128x512xf32>
    %10 = arith.divf %8, %9 : vector<128x512xf32>
    %c0_8 = arith.constant 0 : index
    %c0_9 = arith.constant 0 : index
    %c0_10 = arith.constant 0 : index
    %11 = vector.load %arg5[%c0_8, %c0_9, %c0_10] : memref<1x128x512xf32, #tpu.memory_space<vmem>>, vector<1x128x512xf32>
    %12 = vector.shape_cast %11 : vector<1x128x512xf32> to vector<128x512xf32>
    %13 = vector.shape_cast %10 : vector<128x512xf32> to vector<1x128x512xf32>
    tpu.vector_store %arg5[%c0_8, %c0_9, %c0_10], %13 {strides = array<i32>} : memref<1x128x512xf32, #tpu.memory_space<vmem>>, vector<1x128x512xf32>,
    return
  }
  func.func @transform_0(%arg0: i32, %arg1: i32) -> (i32, i32, i32) {
    %c0_i32 = arith.constant 0 : i32
    %c0_i32_0 = arith.constant 0 : i32
    %c0_i32_1 = arith.constant 0 : i32
    return %arg0, %c0_i32, %c0_i32_0 : i32, i32, i32
  }
  func.func @transform_1(%arg0: i32, %arg1: i32) -> (i32, i32) {
    %c0_i32 = arith.constant 0 : i32
    %c0_i32_0 = arith.constant 0 : i32
    return %arg1, %c0_i32 : i32, i32
  }
  func.func @transform_2(%arg0: i32, %arg1: i32) -> (i32, i32) {
    %c0_i32 = arith.constant 0 : i32
    %c0_i32_0 = arith.constant 0 : i32
    %c0_i32_1 = arith.constant 0 : i32
    return %c0_i32, %c0_i32_0 : i32, i32
  }
  func.func @transform_3(%arg0: i32, %arg1: i32) -> (i32, i32, i32) {
    %c0_i32 = arith.constant 0 : i32
    %c0_i32_0 = arith.constant 0 : i32
    return %arg0, %arg1, %c0_i32 : i32, i32, i32
  }
}

</mosaic_0001>

<bundles_post_ra>
// kernel: fc_discriminator_forward.4
= control target key start
LH: loop header
LB: loop body
LE: loop exit
PB: predicated region body
PF: predicated region fallthrough
CT: control target
= control target key end

     0   :  { %v269_v1 = vmov 0   ;;  %vm88_vm0 = vcmask 523264   ;;  %vm182_vm1 = vcmask 7168   ;;  %s370_s0 = inlined_call_operand.vmem [shape: bf16[64,128], index: 0, kind: input, shape index: {}]   ;;  %s371_s1 = inlined_call_operand.vmem [shape: bf16[32,64], index: 1, kind: input, shape index: {}]   ;;  %s372_s2 = inlined_call_operand.vmem [shape: f32[32,1], index: 2, kind: input, shape index: {}]   ;;  %s373_s3 = inlined_call_operand.vmem [shape: bf16[32,128], index: 3, kind: output, shape index: {0}]   ;;  %s374_s4 = inlined_call_operand.vmem [shape: f32[1,32,1], index: 4, kind: output, shape index: {1}]   ;;  %s375_s5 = inlined_call_operand.vmem [shape: f32[1,32,1], index: 5, kind: output, shape index: {2}]  }
   0x1   :  { %v263_v0 = vld [vmem:[%s370_s0] sm:$0xff]   ;;  %262 = vset.pattern.permute.xlu1 %v269_v1  ;;  %261 = vset.pattern.permute.xlu0 %v269_v1  ;;  %v264_v2 = vld [vmem:[%s370_s0 + $0x8] sm:$0xff]   ;;  %v265_v3 = vld [vmem:[%s370_s0 + $0x10] sm:$0xff]  }
   0x2   :  { %248 = vmatprep.subr.bf16.mxu0 %v263_v0  ;;  %v267_v4 = vld [vmem:[%s371_s1] sm:$0xff]   ;;  %v32_v5 = vld [vmem:[%s372_s2 + $0x10] sm:$0xff]  ;;  %v266_v7 = vld [vmem:[%s370_s0 + $0x18] sm:$0xff]  }
   0x3   :  { %249 = vmatpush3.bf16.msra.mxu0 %v263_v0  ;;  %256 = vmatprep.mubr.msk.bf16.mxu0 %vm88_vm0, %v267_v4  ;;  %v30_v6 = vld [vmem:[%s372_s2] sm:$0xff]  ;;  %v33_v8 = vld [vmem:[%s372_s2 + $0x18] sm:$0xff]  ;;  %v31_v9 = vld [vmem:[%s372_s2 + $0x8] sm:$0xff] }
   0x4   :  { %250 = vmatprep.subr.bf16.mxu0 %v264_v2  ;;  %46 = vperm.xlu1 %262, %v32_v5   ;;  %v268_v10 = vld [vmem:[%s371_s1 + $0x8] sm:$0xff]  }
   0x5   :  { %36 = vperm.xlu0 %261, %v30_v6  }
   0x7   :  { %251 = vmatpush3.bf16.msra.mxu0 %v264_v2 }
   0x8   :  { %252 = vmatprep.subr.bf16.mxu0 %v265_v3  ;;  %51 = vperm.xlu1 %262, %v33_v8  }
   0x9   :  { %41 = vperm.xlu0 %261, %v31_v9  }
   0xb   :  { %253 = vmatpush3.bf16.msra.mxu0 %v265_v3 }
   0xc   :  { %254 = vmatprep.subr.bf16.mxu0 %v266_v7 }
   0xf   :  { %255 = vmatpush3.bf16.msra.mxu0 %v266_v7 }
  0x12   :  { %257 = vmatmul.mubr.msk.bf16.vlgmr.msra.gmra.mrb[0].mxu0 %vm88_vm0, %v268_v10 }
  0x83   :  { %v47_v12 = vpop.permute.xlu1 %46 }
  0x84   :  { %v37_v11 = vpop.permute.xlu0 %36 }
  0x87   :  { %v52_v17 = vpop.permute.xlu1 %51 }
  0x88   :  { %v42_v16 = vpop.permute.xlu0 %41 }
  0xe5   :  { %v258_v13 = vpop.f32.mrb[0].mxu0 }
  0xe6   :  { %v138_v14 = vadd.f32 %v258_v13, %v47_v12  ;;  %v129_v15 = vpop.f32.mrb[1].mxu0 }
  0xe7   :  { %v259_v18 = vpop.f32.mrb[2].mxu0  ;;  %v130_v21 = vadd.f32 %v129_v15, %v37_v11 }
  0xe8   :  { %v141_v19 = vadd.f32 %v259_v18, %v52_v17  ;;  %178 = vadd.xlane.f32.xlu0 %v138_v14  ;;  %v132_v20 = vpop.f32.mrb[3].mxu0  ;;  %v189_v26 = vmul.f32 %v138_v14, %v138_v14 }
  0xe9   :  { %v133_v22 = vadd.f32 %v132_v20, %v42_v16  ;;  %v187_v25 = vmul.f32 %v130_v21, %v130_v21 }
  0xea   :  { %v239_v23 = vpack.c.bf16 %v141_v19, %v138_v14  ;;  %v190_v28 = vmul.f32 %v141_v19, %v141_v19 }
  0xeb   :  { %v234_v24 = vpack.c.bf16 %v133_v22, %v130_v21  ;;  %176 = vadd.xlane.f32.xlu1 %v133_v22  ;;  %v188_v27 = vmul.f32 %v133_v22, %v133_v22 }
  0xec   :  { %241 = vst [vmem:[%s373_s3 + $0x8] sm:$0xff] %v239_v23   ;;  %174 = vadd.xlane.f32.xlu0 %v130_v21 }
  0xed   :  { %235 = vst [vmem:[%s373_s3] sm:$0xff] %v234_v24  }
  0xef   :  { %191 = vadd.xlane.f32.xlu1 %v187_v25 }
  0xf0   :  { %180 = vadd.xlane.f32.xlu0 %v141_v19 }
  0xf3   :  { %195 = vadd.xlane.f32.xlu1 %v189_v26 }
  0xf4   :  { %193 = vadd.xlane.f32.xlu0 %v188_v27 }
  0xf8   :  { %197 = vadd.xlane.f32.xlu0 %v190_v28 }
 0x175   :  { %v179_v29 = vpop.xlane.xlu0 %178 }
 0x176   :  { %185 = vst.msk [vmem:[%s374_s4 + $0x10] sm:$0xff] %vm182_vm1, %v179_v29 }
 0x178   :  { %v177_v30 = vpop.xlane.xlu1 %176 }
 0x179   :  { %184 = vst.msk [vmem:[%s374_s4 + $0x8] sm:$0xff] %vm182_vm1, %v177_v30  ;;  %v175_v31 = vpop.xlane.xlu0 %174 }
 0x17a   :  { %183 = vst.msk [vmem:[%s374_s4] sm:$0xff] %vm182_vm1, %v175_v31 }
 0x17c   :  { %v192_v32 = vpop.xlane.xlu1 %191 }
 0x17d   :  { %199 = vst.msk [vmem:[%s375_s5] sm:$0xff] %vm182_vm1, %v192_v32  ;;  %v181_v33 = vpop.xlane.xlu0 %180 }
 0x17e   :  { %186 = vst.msk [vmem:[%s374_s4 + $0x18] sm:$0xff] %vm182_vm1, %v181_v33 }
 0x180   :  { %v196_v34 = vpop.xlane.xlu1 %195 }
 0x181   :  { %201 = vst.msk [vmem:[%s375_s5 + $0x10] sm:$0xff] %vm182_vm1, %v196_v34  ;;  %v194_v35 = vpop.xlane.xlu0 %193 }
 0x182   :  { %200 = vst.msk [vmem:[%s375_s5 + $0x8] sm:$0xff] %vm182_vm1, %v194_v35 }
 0x185   :  { %v198_v36 = vpop.xlane.xlu0 %197 }
 0x186   :  { %202 = vst.msk [vmem:[%s375_s5 + $0x18] sm:$0xff] %vm182_vm1, %v198_v36 }

// kernel: fc_discriminator_forward.5
= control target key start
LH: loop header
LB: loop body
LE: loop exit
PB: predicated region body
PF: predicated region fallthrough
CT: control target
= control target key end

     0   :  { %v897_v1 = vmov 0   ;;  %v589_v57 = vlaneseq  ;;  %vm618_vm1 = vcmask 7168   ;;  %s1191_s0 = inlined_call_operand.vmem [shape: bf16[512,128], index: 0, kind: input, shape index: {}]   ;;  %s1192_s1 = inlined_call_operand.vmem [shape: bf16[64,512], index: 1, kind: input, shape index: {}]   ;;  %s1193_s2 = inlined_call_operand.vmem [shape: f32[64,1], index: 2, kind: input, shape index: {}]   ;;  %s1194_s3 = inlined_call_operand.vmem [shape: bf16[64,128], index: 3, kind: output, shape index: {0}]   ;;  %s1195_s4 = inlined_call_operand.vmem [shape: f32[1,64,1], index: 4, kind: output, shape index: {1}]   ;;  %s1196_s5 = inlined_call_operand.vmem [shape: f32[1,64,1], index: 5, kind: output, shape index: {2}]  }
   0x1   :  { %v841_v0 = vld [vmem:[%s1191_s0 + $0x40] sm:$0xff]   ;;  %839 = vset.pattern.permute.xlu0 %v897_v1  ;;  %840 = vset.pattern.permute.xlu1 %v897_v1  ;;  %v845_v5 = vld [vmem:[%s1191_s0 + $0x48] sm:$0xff]   ;;  %v849_v9 = vld [vmem:[%s1191_s0 + $0x50] sm:$0xff]  }
   0x2   :  { %v842_v2 = vld [vmem:[%s1191_s0 + $0xc0] sm:$0xff]   ;;  %758 = vmatprep.subr.bf16.mxu0 %v841_v0  ;;  %v846_v6 = vld [vmem:[%s1191_s0 + $0xc8] sm:$0xff]   ;;  %v850_v10 = vld [vmem:[%s1191_s0 + $0xd0] sm:$0xff]   ;;  %v1096_v62 = vand.u32 127, %v589_v57 }
   0x3   :  { %v843_v3 = vld [vmem:[%s1191_s0] sm:$0xff]   ;;  %798 = vmatprep.subr.bf16.mxu1 %v842_v2  ;;  %v847_v7 = vld [vmem:[%s1191_s0 + $0x8] sm:$0xff]   ;;  %v851_v11 = vld [vmem:[%s1191_s0 + $0x10] sm:$0xff]  }
   0x4   :  { %v844_v4 = vld [vmem:[%s1191_s0 + $0x80] sm:$0xff]   ;;  %759 = vmatpush3.bf16.msra.mxu0 %v843_v3  ;;  %v848_v8 = vld [vmem:[%s1191_s0 + $0x88] sm:$0xff]   ;;  %v852_v12 = vld [vmem:[%s1191_s0 + $0x90] sm:$0xff]   ;;  %vm593_vm0 = vcmp.lt.s32.totalorder %v1096_v62, 32 }
   0x5   :  { %799 = vmatpush3.bf16.msra.mxu1 %v844_v4  ;;  %760 = vmatprep.subr.bf16.mxu0 %v845_v5  ;;  %v853_v13 = vld [vmem:[%s1191_s0 + $0x58] sm:$0xff]   ;;  %v857_v17 = vld [vmem:[%s1191_s0 + $0x60] sm:$0xff]   ;;  %v861_v21 = vld [vmem:[%s1191_s0 + $0x68] sm:$0xff]  }
   0x6   :  { %800 = vmatprep.subr.bf16.mxu1 %v846_v6  ;;  %v854_v14 = vld [vmem:[%s1191_s0 + $0xd8] sm:$0xff]   ;;  %v858_v18 = vld [vmem:[%s1191_s0 + $0xe0] sm:$0xff]   ;;  %v862_v22 = vld [vmem:[%s1191_s0 + $0xe8] sm:$0xff]  }
   0x7   :  { %v855_v15 = vld [vmem:[%s1191_s0 + $0x18] sm:$0xff]   ;;  %v859_v19 = vld [vmem:[%s1191_s0 + $0x20] sm:$0xff]   ;;  %v863_v23 = vld [vmem:[%s1191_s0 + $0x28] sm:$0xff]  }
   0x8   :  { %761 = vmatpush3.bf16.msra.mxu0 %v847_v7  ;;  %v856_v16 = vld [vmem:[%s1191_s0 + $0x98] sm:$0xff]   ;;  %v860_v20 = vld [vmem:[%s1191_s0 + $0xa0] sm:$0xff]   ;;  %v864_v24 = vld [vmem:[%s1191_s0 + $0xa8] sm:$0xff]  }
   0x9   :  { %801 = vmatpush3.bf16.msra.mxu1 %v848_v8  ;;  %762 = vmatprep.subr.bf16.mxu0 %v849_v9  ;;  %v865_v25 = vld [vmem:[%s1191_s0 + $0x70] sm:$0xff]   ;;  %v869_v29 = vld [vmem:[%s1191_s0 + $0x78] sm:$0xff]   ;;  %v98_v43 = vld [vmem:[%s1193_s2] sm:$0xff] }
   0xa   :  { %802 = vmatprep.subr.bf16.mxu1 %v850_v10  ;;  %v866_v26 = vld [vmem:[%s1191_s0 + $0xf0] sm:$0xff]   ;;  %v870_v30 = vld [vmem:[%s1191_s0 + $0xf8] sm:$0xff]   ;;  %108 = vperm.xlu0 %839, %v98_v43   ;;  %v99_v45 = vld [vmem:[%s1193_s2 + $0x8] sm:$0xff] }
   0xb   :  { %v867_v27 = vld [vmem:[%s1191_s0 + $0x30] sm:$0xff]   ;;  %v871_v31 = vld [vmem:[%s1191_s0 + $0x38] sm:$0xff]   ;;  %v102_v48 = vld [vmem:[%s1193_s2 + $0x20] sm:$0xff] }
   0xc   :  { %763 = vmatpush3.bf16.msra.mxu0 %v851_v11  ;;  %v868_v28 = vld [vmem:[%s1191_s0 + $0xb0] sm:$0xff]   ;;  %v872_v32 = vld [vmem:[%s1191_s0 + $0xb8] sm:$0xff]   ;;  %v103_v51 = vld [vmem:[%s1193_s2 + $0x28] sm:$0xff] }
   0xd   :  { %803 = vmatpush3.bf16.msra.mxu1 %v852_v12  ;;  %764 = vmatprep.subr.bf16.mxu0 %v853_v13  ;;  %v873_v33 = vld [vmem:[%s1192_s1] ss:$16 sps:$4 sm:$0xff]   ;;  %v875_v34 = vld [vmem:[%s1192_s1 + $0x4] ss:$16 sps:$4 sm:$0xff]   ;;  %v876_v35 = vld [vmem:[%s1192_s1 + $0x8] ss:$16 sps:$4 sm:$0xff]  }
   0xe   :  { %804 = vmatprep.subr.bf16.mxu1 %v854_v14  ;;  %v878_v36 = vld [vmem:[%s1192_s1 + $0xc] ss:$16 sps:$4 sm:$0xff]   ;;  %450 = vmatprep.mubr.bf16.mxu0 %v875_v34  ;;  %v879_v37 = vld [vmem:[%s1192_s1 + $0x24] ss:$16 sps:$4 sm:$0xff]   ;;  %v883_v39 = vld [vmem:[%s1192_s1 + $0x20] ss:$16 sps:$4 sm:$0xff]  }
   0xf   :  { %515 = vmatprep.mubr.bf16.mxu1 %v878_v36  ;;  %v881_v38 = vld [vmem:[%s1192_s1 + $0x2c] ss:$16 sps:$4 sm:$0xff]   ;;  %v884_v40 = vld [vmem:[%s1192_s1 + $0x28] ss:$16 sps:$4 sm:$0xff]   ;;  %v885_v41 = vld [vmem:[%s1192_s1 + $0x44] ss:$16 sps:$4 sm:$0xff]   ;;  %113 = vperm.xlu0 %839, %v99_v45  }
  0x10   :  { %765 = vmatpush3.bf16.msra.mxu0 %v855_v15  ;;  %v888_v42 = vld [vmem:[%s1192_s1 + $0x4c] ss:$16 sps:$4 sm:$0xff]   ;;  %v100_v44 = vld [vmem:[%s1193_s2 + $0x10] sm:$0xff]  ;;  %v890_v49 = vld [vmem:[%s1192_s1 + $0x48] ss:$16 sps:$4 sm:$0xff]  }
  0x11   :  { %805 = vmatpush3.bf16.msra.mxu1 %v856_v16  ;;  %766 = vmatprep.subr.bf16.mxu0 %v857_v17  ;;  %v101_v46 = vld [vmem:[%s1193_s2 + $0x18] sm:$0xff]  ;;  %v887_v47 = vld [vmem:[%s1192_s1 + $0x40] ss:$16 sps:$4 sm:$0xff]   ;;  %v891_v50 = vld [vmem:[%s1192_s1 + $0x64] ss:$16 sps:$4 sm:$0xff]  }
  0x12   :  { %806 = vmatprep.subr.bf16.mxu1 %v858_v18  ;;  %118 = vperm.xlu1 %840, %v100_v44   ;;  %v894_v52 = vld [vmem:[%s1192_s1 + $0x6c] ss:$16 sps:$4 sm:$0xff]   ;;  %v104_v53 = vld [vmem:[%s1193_s2 + $0x30] sm:$0xff]  ;;  %v896_v56 = vld [vmem:[%s1192_s1 + $0x68] ss:$16 sps:$4 sm:$0xff]  }
  0x13   :  { %128 = vperm.xlu0 %839, %v102_v48   ;;  %v105_v54 = vld [vmem:[%s1193_s2 + $0x38] sm:$0xff]  ;;  %v893_v55 = vld [vmem:[%s1192_s1 + $0x60] ss:$16 sps:$4 sm:$0xff]  }
  0x14   :  { %767 = vmatpush3.bf16.msra.mxu0 %v859_v19 }
  0x15   :  { %807 = vmatpush3.bf16.msra.mxu1 %v860_v20  ;;  %768 = vmatprep.subr.bf16.mxu0 %v861_v21 }
  0x16   :  { %808 = vmatprep.subr.bf16.mxu1 %v862_v22  ;;  %123 = vperm.xlu1 %840, %v101_v46  }
  0x17   :  { %138 = vperm.xlu0 %839, %v104_v53  }
  0x18   :  { %769 = vmatpush3.bf16.msra.mxu0 %v863_v23 }
  0x19   :  { %809 = vmatpush3.bf16.msra.mxu1 %v864_v24  ;;  %770 = vmatprep.subr.bf16.mxu0 %v865_v25 }
  0x1a   :  { %810 = vmatprep.subr.bf16.mxu1 %v866_v26  ;;  %133 = vperm.xlu1 %840, %v103_v51  }
  0x1c   :  { %771 = vmatpush3.bf16.msra.mxu0 %v867_v27 }
  0x1d   :  { %811 = vmatpush3.bf16.msra.mxu1 %v868_v28  ;;  %772 = vmatprep.subr.bf16.mxu0 %v869_v29 }
  0x1e   :  { %812 = vmatprep.subr.bf16.mxu1 %v870_v30  ;;  %143 = vperm.xlu1 %840, %v105_v54  }
  0x20   :  { %773 = vmatpush3.bf16.msra.mxu0 %v871_v31 }
  0x21   :  { %813 = vmatpush3.bf16.msra.mxu1 %v872_v32 }
  0x23   :  { %451 = vmatmul.mubr.bf16.vlgmr.msra.gmra.mrb[0].mxu0 %v873_v33 }
  0x24   :  { %516 = vmatmul.mubr.bf16.vlgmr.msra.gmra.mrb[0].mxu1 %v876_v35  ;;  %458 = vmatprep.mubr.bf16.mxu0 %v879_v37 }
  0x25   :  { %523 = vmatprep.mubr.bf16.mxu1 %v881_v38 }
  0x2b   :  { %459 = vmatmul.mubr.bf16.gmra.mrb[4].mxu0 %v883_v39 }
  0x2c   :  { %524 = vmatmul.mubr.bf16.gmra.mrb[4].mxu1 %v884_v40  ;;  %466 = vmatprep.mubr.bf16.mxu0 %v885_v41 }
  0x2d   :  { %531 = vmatprep.mubr.bf16.mxu1 %v888_v42 }
  0x33   :  { %467 = vmatmul.mubr.bf16.gmra.mrb[8].mxu0 %v887_v47 }
  0x34   :  { %532 = vmatmul.mubr.bf16.gmra.mrb[8].mxu1 %v890_v49  ;;  %474 = vmatprep.mubr.bf16.mxu0 %v891_v50 }
  0x35   :  { %539 = vmatprep.mubr.bf16.mxu1 %v894_v52 }
  0x3b   :  { %475 = vmatmul.mubr.bf16.gmra.mrb[12].mxu0 %v893_v55 }
  0x3c   :  { %540 = vmatmul.mubr.bf16.gmra.mrb[12].mxu1 %v896_v56 }
  0x89   :  { %v109_v58 = vpop.permute.xlu0 %108 }
  0x8e   :  { %v114_v8 = vpop.permute.xlu0 %113 }
  0x91   :  { %v119_v12 = vpop.permute.xlu1 %118 }
  0x92   :  { %v129_v35 = vpop.permute.xlu0 %128 }
  0x95   :  { %v124_v30 = vpop.permute.xlu1 %123 }
  0x99   :  { %v134_v53 = vpop.permute.xlu1 %133 }
  0xf6   :  { %v774_v59 = vpop.f32.mrb[0].mxu0 }
  0xf7   :  { %v814_v60 = vpop.f32.mrb[0].mxu1  ;;  %v775_v61 = vpop.f32.mrb[1].mxu0 }
  0xf8   :  { %v776_v63 = vadd.f32 %v775_v61, %v774_v59  ;;  %v815_v0 = vpop.f32.mrb[1].mxu1  ;;  %v777_v1 = vpop.f32.mrb[2].mxu0 }
  0xf9   :  { %v816_v2 = vadd.f32 %v815_v0, %v814_v60  ;;  %v817_v3 = vpop.f32.mrb[2].mxu1  ;;  %v778_v4 = vpop.f32.mrb[3].mxu0 }
  0xfa   :  { %v453_v5 = vadd.f32 %v776_v63, %v109_v58  ;;  %v779_v6 = vadd.f32 %v778_v4, %v777_v1  ;;  %v818_v7 = vpop.f32.mrb[3].mxu1  ;;  %v139_v58 = vpop.permute.xlu0 %138 }
  0xfb   :  { %v819_v9 = vadd.f32 %v818_v7, %v817_v3 }
  0xfc   :  { %v456_v10 = vadd.f32 %v779_v6, %v114_v8  ;;  %v518_v11 = vadd.f32 %v816_v2, %v453_v5 }
  0xfe   :  { %v780_v13 = vpop.f32.mrb[4].mxu0  ;;  %v594_v14 = vsel %vm593_vm0, %v518_v11, 0.0  ;;  %v521_v15 = vadd.f32 %v819_v9, %v456_v10 }
  0xff   :  { %v820_v16 = vpop.f32.mrb[4].mxu1  ;;  %v781_v17 = vpop.f32.mrb[5].mxu0  ;;  %602 = vadd.xlane.f32.xlu0 %v594_v14  ;;  %v627_v32 = vmul.f32 %v594_v14, %v594_v14 }
 0x100   :  { %v782_v18 = vadd.f32 %v781_v17, %v780_v13  ;;  %v821_v19 = vpop.f32.mrb[5].mxu1  ;;  %v783_v20 = vpop.f32.mrb[6].mxu0  ;;  %v595_v21 = vsel %vm593_vm0, %v521_v15, 0.0  ;;  %v738_v22 = vpack.c.bf16 %v521_v15, %v518_v11 }
 0x101   :  { %v822_v23 = vadd.f32 %v821_v19, %v820_v16  ;;  %v823_v24 = vpop.f32.mrb[6].mxu1  ;;  %v784_v25 = vpop.f32.mrb[7].mxu0  ;;  %604 = vadd.xlane.f32.xlu1 %v595_v21  ;;  %v628_v26 = vmul.f32 %v595_v21, %v595_v21 }
 0x102   :  { %v461_v27 = vadd.f32 %v782_v18, %v119_v12  ;;  %v785_v28 = vadd.f32 %v784_v25, %v783_v20  ;;  %v824_v29 = vpop.f32.mrb[7].mxu1  ;;  %739 = vst [vmem:[%s1194_s3] sm:$0xff] %v738_v22   ;;  %v144_v13 = vpop.permute.xlu1 %143 }
 0x103   :  { %v825_v31 = vadd.f32 %v824_v29, %v823_v24  ;;  %637 = vadd.xlane.f32.xlu0 %v628_v26 }
 0x104   :  { %v464_v33 = vadd.f32 %v785_v28, %v124_v30  ;;  %v526_v34 = vadd.f32 %v822_v23, %v461_v27 }
 0x105   :  { %635 = vadd.xlane.f32.xlu1 %v627_v32 }
 0x106   :  { %v786_v36 = vpop.f32.mrb[8].mxu0  ;;  %v596_v37 = vsel %vm593_vm0, %v526_v34, 0.0  ;;  %v529_v38 = vadd.f32 %v825_v31, %v464_v33 }
 0x107   :  { %v787_v39 = vpop.f32.mrb[9].mxu0  ;;  %v826_v40 = vpop.f32.mrb[8].mxu1  ;;  %606 = vadd.xlane.f32.xlu0 %v596_v37  ;;  %v629_v41 = vmul.f32 %v596_v37, %v596_v37 }
 0x108   :  { %v788_v42 = vadd.f32 %v787_v39, %v786_v36  ;;  %v789_v43 = vpop.f32.mrb[10].mxu0  ;;  %v827_v44 = vpop.f32.mrb[9].mxu1  ;;  %v743_v45 = vpack.c.bf16 %v529_v38, %v526_v34  ;;  %v597_v52 = vsel %vm593_vm0, %v529_v38, 0.0 }
 0x109   :  { %v828_v46 = vadd.f32 %v827_v44, %v826_v40  ;;  %v790_v47 = vpop.f32.mrb[11].mxu0  ;;  %v829_v48 = vpop.f32.mrb[10].mxu1  ;;  %639 = vadd.xlane.f32.xlu1 %v629_v41  ;;  %v630_v57 = vmul.f32 %v597_v52, %v597_v52 }
 0x10a   :  { %v469_v49 = vadd.f32 %v788_v42, %v129_v35  ;;  %v791_v50 = vadd.f32 %v790_v47, %v789_v43  ;;  %v830_v51 = vpop.f32.mrb[11].mxu1  ;;  %755 = vst [vmem:[%s1194_s3 + $0x8] sm:$0xff] %v743_v45  }
 0x10b   :  { %v831_v54 = vadd.f32 %v830_v51, %v829_v48  ;;  %608 = vadd.xlane.f32.xlu0 %v597_v52 }
 0x10c   :  { %v472_v55 = vadd.f32 %v791_v50, %v134_v53  ;;  %v534_v56 = vadd.f32 %v828_v46, %v469_v49 }
 0x10e   :  { %v792_v59 = vpop.f32.mrb[12].mxu0  ;;  %v598_v60 = vsel %vm593_vm0, %v534_v56, 0.0  ;;  %v537_v61 = vadd.f32 %v831_v54, %v472_v55 }
 0x10f   :  { %v793_v63 = vpop.f32.mrb[13].mxu0  ;;  %v832_v0 = vpop.f32.mrb[12].mxu1  ;;  %641 = vadd.xlane.f32.xlu0 %v630_v57  ;;  %610 = vadd.xlane.f32.xlu1 %v598_v60  ;;  %v631_v8 = vmul.f32 %v598_v60, %v598_v60 }
 0x110   :  { %v794_v1 = vadd.f32 %v793_v63, %v792_v59  ;;  %v795_v2 = vpop.f32.mrb[14].mxu0  ;;  %v833_v3 = vpop.f32.mrb[13].mxu1  ;;  %v748_v4 = vpack.c.bf16 %v537_v61, %v534_v56  ;;  %v599_v12 = vsel %vm593_vm0, %v537_v61, 0.0 }
 0x111   :  { %v834_v5 = vadd.f32 %v833_v3, %v832_v0  ;;  %v796_v6 = vpop.f32.mrb[15].mxu0  ;;  %v835_v7 = vpop.f32.mrb[14].mxu1  ;;  %v632_v17 = vmul.f32 %v599_v12, %v599_v12 }
 0x112   :  { %v477_v9 = vadd.f32 %v794_v1, %v139_v58  ;;  %v797_v10 = vadd.f32 %v796_v6, %v795_v2  ;;  %v836_v11 = vpop.f32.mrb[15].mxu1  ;;  %756 = vst [vmem:[%s1194_s3 + $0x10] sm:$0xff] %v748_v4  }
 0x113   :  { %v837_v14 = vadd.f32 %v836_v11, %v835_v7  ;;  %612 = vadd.xlane.f32.xlu0 %v599_v12  ;;  %643 = vadd.xlane.f32.xlu1 %v631_v8 }
 0x114   :  { %v480_v15 = vadd.f32 %v797_v10, %v144_v13  ;;  %v542_v16 = vadd.f32 %v834_v5, %v477_v9 }
 0x116   :  { %v600_v18 = vsel %vm593_vm0, %v542_v16, 0.0  ;;  %v545_v19 = vadd.f32 %v837_v14, %v480_v15 }
 0x117   :  { %645 = vadd.xlane.f32.xlu0 %v632_v17  ;;  %614 = vadd.xlane.f32.xlu1 %v600_v18  ;;  %v633_v21 = vmul.f32 %v600_v18, %v600_v18 }
 0x118   :  { %v753_v20 = vpack.c.bf16 %v545_v19, %v542_v16  ;;  %v601_v22 = vsel %vm593_vm0, %v545_v19, 0.0 }
 0x119   :  { %v634_v23 = vmul.f32 %v601_v22, %v601_v22 }
 0x11a   :  { %757 = vst [vmem:[%s1194_s3 + $0x18] sm:$0xff] %v753_v20  }
 0x11b   :  { %616 = vadd.xlane.f32.xlu0 %v601_v22  ;;  %647 = vadd.xlane.f32.xlu1 %v633_v21 }
 0x11f   :  { %649 = vadd.xlane.f32.xlu0 %v634_v23 }
 0x18c   :  { %v603_v24 = vpop.xlane.xlu0 %602 }
 0x18d   :  { %619 = vst.msk [vmem:[%s1195_s4] sm:$0xff] %vm618_vm1, %v603_v24 }
 0x18e   :  { %v605_v25 = vpop.xlane.xlu1 %604 }
 0x18f   :  { %620 = vst.msk [vmem:[%s1195_s4 + $0x8] sm:$0xff] %vm618_vm1, %v605_v25 }
 0x190   :  { %v638_v26 = vpop.xlane.xlu0 %637 }
 0x191   :  { %652 = vst.msk [vmem:[%s1196_s5 + $0x8] sm:$0xff] %vm618_vm1, %v638_v26 }
 0x192   :  { %v636_v62 = vpop.xlane.xlu1 %635 }
 0x193   :  { %651 = vst.msk [vmem:[%s1196_s5] sm:$0xff] %vm618_vm1, %v636_v62 }
 0x194   :  { %v607_v27 = vpop.xlane.xlu0 %606 }
 0x195   :  { %621 = vst.msk [vmem:[%s1195_s4 + $0x10] sm:$0xff] %vm618_vm1, %v607_v27 }
 0x196   :  { %v640_v28 = vpop.xlane.xlu1 %639 }
 0x197   :  { %653 = vst.msk [vmem:[%s1196_s5 + $0x10] sm:$0xff] %vm618_vm1, %v640_v28 }
 0x198   :  { %v609_v29 = vpop.xlane.xlu0 %608 }
 0x199   :  { %622 = vst.msk [vmem:[%s1195_s4 + $0x18] sm:$0xff] %vm618_vm1, %v609_v29 }
 0x19c   :  { %v642_v30 = vpop.xlane.xlu0 %641  ;;  %v611_v31 = vpop.xlane.xlu1 %610 }
 0x19d   :  { %654 = vst.msk [vmem:[%s1196_s5 + $0x18] sm:$0xff] %vm618_vm1, %v642_v30  ;;  %623 = vst.msk [vmem:[%s1195_s4 + $0x20] sm:$0xff] %vm618_vm1, %v611_v31 }
 0x1a0   :  { %v613_v32 = vpop.xlane.xlu0 %612  ;;  %v644_v33 = vpop.xlane.xlu1 %643 }
 0x1a1   :  { %624 = vst.msk [vmem:[%s1195_s4 + $0x28] sm:$0xff] %vm618_vm1, %v613_v32  ;;  %655 = vst.msk [vmem:[%s1196_s5 + $0x20] sm:$0xff] %vm618_vm1, %v644_v33 }
 0x1a4   :  { %v646_v34 = vpop.xlane.xlu0 %645  ;;  %v615_v35 = vpop.xlane.xlu1 %614 }
 0x1a5   :  { %656 = vst.msk [vmem:[%s1196_s5 + $0x28] sm:$0xff] %vm618_vm1, %v646_v34  ;;  %625 = vst.msk [vmem:[%s1195_s4 + $0x30] sm:$0xff] %vm618_vm1, %v615_v35 }
 0x1a8   :  { %v617_v36 = vpop.xlane.xlu0 %616  ;;  %v648_v37 = vpop.xlane.xlu1 %647 }
 0x1a9   :  { %626 = vst.msk [vmem:[%s1195_s4 + $0x38] sm:$0xff] %vm618_vm1, %v617_v36  ;;  %657 = vst.msk [vmem:[%s1196_s5 + $0x30] sm:$0xff] %vm618_vm1, %v648_v37 }
 0x1ac   :  { %v650_v38 = vpop.xlane.xlu0 %649 }
 0x1ad   :  { %658 = vst.msk [vmem:[%s1196_s5 + $0x38] sm:$0xff] %vm618_vm1, %v650_v38 }

// kernel: fc_discriminator_forward.6
= control target key start
LH: loop header
LB: loop body
LE: loop exit
PB: predicated region body
PF: predicated region fallthrough
CT: control target
= control target key end

     0   :  { %v983_v1 = vmov 0   ;;  %v152_v24 = vlaneseq  ;;  %v984_v25 = vmov 1966171168   ;;  %s1223_s0 = inlined_call_operand.vmem [shape: bf16[1024,128], index: 0, kind: input, shape index: {}]   ;;  %s1224_s2 = inlined_call_operand.<no memory space> [shape: f32[1,1], index: 2, kind: input, shape index: {}]   ;;  %s1225_s1 = inlined_call_operand.vmem [shape: bf16[1,1024], index: 1, kind: input, shape index: {}]   ;;  %s1226_s3 = inlined_call_operand.vmem [shape: f32[1,128], index: 3, kind: output, shape index: {}]  }
   0x1   :  { %v918_v0 = vld [vmem:[%s1223_s0 + $0x40] sm:$0xff]   ;;  %917 = vset.pattern.permute.xlu0 %v983_v1  ;;  %v8_v2 = vstv %s1224_s2  ;;  %v922_v6 = vld [vmem:[%s1223_s0 + $0x48] sm:$0xff]   ;;  %v926_v10 = vld [vmem:[%s1223_s0 + $0x50] sm:$0xff]   ;;  %v159_v26 = vunpack.c.l.s4 %v984_v25 }
   0x2   :  { %v919_v3 = vld [vmem:[%s1223_s0 + $0xc0] sm:$0xff]   ;;  %9 = vst [vmem:[#allocation2] sm:$0x1] %v8_v2  ;;  %827 = vmatprep.subr.bf16.mxu0 %v918_v0  ;;  %v923_v7 = vld [vmem:[%s1223_s0 + $0xc8] sm:$0xff]   ;;  %v927_v11 = vld [vmem:[%s1223_s0 + $0xd0] sm:$0xff]   ;;  %v1086_v31 = vshrl.u32 %v152_v24, 7 }
   0x3   :  { %v920_v4 = vld [vmem:[%s1223_s0] sm:$0xff]   ;;  %849 = vmatprep.subr.bf16.mxu1 %v919_v3  ;;  %v924_v8 = vld [vmem:[%s1223_s0 + $0x8] sm:$0xff]   ;;  %v928_v12 = vld [vmem:[%s1223_s0 + $0x10] sm:$0xff]   ;;  %v160_v32 = vunpack.c.0.s8 %v159_v26 }
   0x4   :  { %v921_v5 = vld [vmem:[%s1223_s0 + $0x80] sm:$0xff]   ;;  %828 = vmatpush3.bf16.msra.mxu0 %v920_v4  ;;  %v925_v9 = vld [vmem:[%s1223_s0 + $0x88] sm:$0xff]   ;;  %v929_v13 = vld [vmem:[%s1223_s0 + $0x90] sm:$0xff]  }
   0x5   :  { %850 = vmatpush3.bf16.msra.mxu1 %v921_v5  ;;  %829 = vmatprep.subr.bf16.mxu0 %v922_v6  ;;  %v930_v14 = vld [vmem:[%s1223_s0 + $0x58] sm:$0xff]   ;;  %v934_v18 = vld [vmem:[%s1223_s0 + $0x60] sm:$0xff]   ;;  %v938_v22 = vld [vmem:[%s1223_s0 + $0x68] sm:$0xff]   ;;  %v1101_v37 = vsub.s32 %v160_v32, %v1086_v31 }
   0x6   :  { %851 = vmatprep.subr.bf16.mxu1 %v923_v7  ;;  %v931_v15 = vld [vmem:[%s1223_s0 + $0xd8] sm:$0xff]   ;;  %v935_v19 = vld [vmem:[%s1223_s0 + $0xe0] sm:$0xff]   ;;  %v939_v23 = vld [vmem:[%s1223_s0 + $0xe8] sm:$0xff]  }
   0x7   :  { %v932_v16 = vld [vmem:[%s1223_s0 + $0x18] sm:$0xff]   ;;  %v936_v20 = vld [vmem:[%s1223_s0 + $0x20] sm:$0xff]   ;;  %v940_v27 = vld [vmem:[%s1223_s0 + $0x28] sm:$0xff]  }
   0x8   :  { %830 = vmatpush3.bf16.msra.mxu0 %v924_v8  ;;  %v933_v17 = vld [vmem:[%s1223_s0 + $0x98] sm:$0xff]   ;;  %v937_v21 = vld [vmem:[%s1223_s0 + $0xa0] sm:$0xff]   ;;  %v941_v28 = vld [vmem:[%s1223_s0 + $0xa8] sm:$0xff]  }
   0x9   :  { %852 = vmatpush3.bf16.msra.mxu1 %v925_v9  ;;  %831 = vmatprep.subr.bf16.mxu0 %v926_v10  ;;  %v942_v29 = vld [vmem:[%s1223_s0 + $0x70] sm:$0xff]   ;;  %v946_v35 = vld [vmem:[%s1223_s0 + $0x78] sm:$0xff]   ;;  %v17_v40 = vld [vmem:[%s1225_s1] sm:$0xff] }
   0xa   :  { %853 = vmatprep.subr.bf16.mxu1 %v927_v11  ;;  %v943_v30 = vld [vmem:[%s1223_s0 + $0xf0] sm:$0xff]   ;;  %v947_v36 = vld [vmem:[%s1223_s0 + $0xf8] sm:$0xff]   ;;  %v157_v41 = vcombine.high %v17_v40, %v17_v40  ;;  %v164_v42 = vrot.slane %v17_v40, %v1101_v37  ;;  %v951_v43 = vld [vmem:[%s1223_s0 + $0x140] sm:$0xff]  }
   0xb   :  { %v944_v33 = vld [vmem:[%s1223_s0 + $0x30] sm:$0xff]   ;;  %v948_v38 = vld [vmem:[%s1223_s0 + $0x38] sm:$0xff]   ;;  %v952_v44 = vld [vmem:[%s1223_s0 + $0x1c0] sm:$0xff]  }
   0xc   :  { %832 = vmatpush3.bf16.msra.mxu0 %v928_v12  ;;  %v945_v34 = vld [vmem:[%s1223_s0 + $0xb0] sm:$0xff]   ;;  %v949_v39 = vld [vmem:[%s1223_s0 + $0xb8] sm:$0xff]   ;;  %v172_v45 = vcombine.high %v164_v42, %v164_v42  ;;  %v180_v46 = vrot.slane %v164_v42, %v1101_v37  ;;  %v1121_v47 = vrot.slane %v157_v41, %v1101_v37  ;;  %v953_v49 = vld [vmem:[%s1223_s0 + $0x100] sm:$0xff]  }
   0xd   :  { %854 = vmatpush3.bf16.msra.mxu1 %v929_v13  ;;  %833 = vmatprep.subr.bf16.mxu0 %v930_v14  ;;  %v955_v52 = vld [vmem:[%s1223_s0 + $0x148] sm:$0xff]   ;;  %v954_v54 = vld [vmem:[%s1223_s0 + $0x180] sm:$0xff]   ;;  %v959_v59 = vld [vmem:[%s1223_s0 + $0x150] sm:$0xff]  }
   0xe   :  { %855 = vmatprep.subr.bf16.mxu1 %v931_v15  ;;  %v194_v48 = vrot.slane %v172_v45, %v1101_v37  ;;  %v173_v50 = vcombine.high %v1121_v47, %v1121_v47  ;;  %v202_v51 = vcombine.high %v180_v46, %v180_v46  ;;  %v956_v56 = vld [vmem:[%s1223_s0 + $0x1c8] sm:$0xff]   ;;  %v960_v61 = vld [vmem:[%s1223_s0 + $0x1d0] sm:$0xff]   ;;  %v963_v63 = vld [vmem:[%s1223_s0 + $0x158] sm:$0xff]  }
   0xf   :  { %v957_v57 = vld [vmem:[%s1223_s0 + $0x108] sm:$0xff]   ;;  %v961_v62 = vld [vmem:[%s1223_s0 + $0x110] sm:$0xff]   ;;  %v964_v1 = vld [vmem:[%s1223_s0 + $0x1d8] sm:$0xff]  }
  0x10   :  { %834 = vmatpush3.bf16.msra.mxu0 %v932_v16  ;;  %630 = vmatprep.mubr.bf16.mxu0 %v194_v48  ;;  %v204_v53 = vcombine.high %v194_v48, %v194_v48  ;;  %v201_v55 = vrot.slane %v173_v50, %v1101_v37  ;;  %v958_v60 = vld [vmem:[%s1223_s0 + $0x188] sm:$0xff]   ;;  %v962_v0 = vld [vmem:[%s1223_s0 + $0x190] sm:$0xff]   ;;  %v965_v2 = vld [vmem:[%s1223_s0 + $0x118] sm:$0xff]  }
  0x11   :  { %856 = vmatpush3.bf16.msra.mxu1 %v933_v17  ;;  %835 = vmatprep.subr.bf16.mxu0 %v934_v18  ;;  %v967_v3 = vld [vmem:[%s1223_s0 + $0x160] sm:$0xff]   ;;  %v966_v4 = vld [vmem:[%s1223_s0 + $0x198] sm:$0xff]   ;;  %v971_v7 = vld [vmem:[%s1223_s0 + $0x168] sm:$0xff]  }
  0x12   :  { %857 = vmatprep.subr.bf16.mxu1 %v935_v19  ;;  %670 = vmatprep.mubr.bf16.mxu1 %v204_v53  ;;  %v205_v58 = vcombine.high %v201_v55, %v201_v55  ;;  %v968_v5 = vld [vmem:[%s1223_s0 + $0x1e0] sm:$0xff]   ;;  %v972_v9 = vld [vmem:[%s1223_s0 + $0x1e8] sm:$0xff]   ;;  %v975_v11 = vld [vmem:[%s1223_s0 + $0x170] sm:$0xff]  }
  0x13   :  { %v969_v6 = vld [vmem:[%s1223_s0 + $0x120] sm:$0xff]   ;;  %v973_v10 = vld [vmem:[%s1223_s0 + $0x128] sm:$0xff]   ;;  %v976_v13 = vld [vmem:[%s1223_s0 + $0x1f0] sm:$0xff]  }
  0x14   :  { %836 = vmatpush3.bf16.msra.mxu0 %v936_v20  ;;  %v970_v8 = vld [vmem:[%s1223_s0 + $0x1a0] sm:$0xff]   ;;  %v974_v12 = vld [vmem:[%s1223_s0 + $0x1a8] sm:$0xff]   ;;  %v977_v14 = vld [vmem:[%s1223_s0 + $0x130] sm:$0xff]   ;;  %v187_v20 = vrot.slane %v1121_v47, %v1101_v37 }
  0x15   :  { %858 = vmatpush3.bf16.msra.mxu1 %v937_v21  ;;  %837 = vmatprep.subr.bf16.mxu0 %v938_v22  ;;  %v979_v15 = vld [vmem:[%s1223_s0 + $0x178] sm:$0xff]   ;;  %v978_v16 = vld [vmem:[%s1223_s0 + $0x1b0] sm:$0xff]   ;;  %v146_v18 = vld [vmem:[#allocation2] sm:$0x1] }
  0x16   :  { %859 = vmatprep.subr.bf16.mxu1 %v939_v23  ;;  %v980_v17 = vld [vmem:[%s1223_s0 + $0x1f8] sm:$0xff]   ;;  %149 = vperm.xlu0 %917, %v146_v18   ;;  %v203_v22 = vcombine.high %v187_v20, %v187_v20  ;;  %v154_v23 = vsub.s32 0, %v1086_v31 }
  0x17   :  { %v981_v19 = vld [vmem:[%s1223_s0 + $0x138] sm:$0xff]  }
  0x18   :  { %838 = vmatpush3.bf16.msra.mxu0 %v940_v27  ;;  %v982_v21 = vld [vmem:[%s1223_s0 + $0x1b8] sm:$0xff]  }
  0x19   :  { %860 = vmatpush3.bf16.msra.mxu1 %v941_v28  ;;  %839 = vmatprep.subr.bf16.mxu0 %v942_v29 }
  0x1a   :  { %861 = vmatprep.subr.bf16.mxu1 %v943_v30 }
  0x1c   :  { %840 = vmatpush3.bf16.msra.mxu0 %v944_v33 }
  0x1d   :  { %862 = vmatpush3.bf16.msra.mxu1 %v945_v34  ;;  %841 = vmatprep.subr.bf16.mxu0 %v946_v35 }
  0x1e   :  { %863 = vmatprep.subr.bf16.mxu1 %v947_v36 }
  0x20   :  { %842 = vmatpush3.bf16.msra.mxu0 %v948_v38 }
  0x21   :  { %864 = vmatpush3.bf16.msra.mxu1 %v949_v39  ;;  %871 = vmatprep.subr.bf16.mxu0 %v951_v43 }
  0x22   :  { %893 = vmatprep.subr.bf16.mxu1 %v952_v44 }
  0x23   :  { %631 = vmatmul.mubr.bf16.vlgmr.msra.gmra.mrb[0].mxu0 %v180_v46 }
  0x24   :  { %872 = vmatpush3.bf16.msra.mxu0 %v953_v49  ;;  %671 = vmatmul.mubr.bf16.vlgmr.msra.gmra.mrb[0].mxu1 %v202_v51 }
  0x25   :  { %873 = vmatprep.subr.bf16.mxu0 %v955_v52  ;;  %894 = vmatpush3.bf16.msra.mxu1 %v954_v54 }
  0x26   :  { %710 = vmatprep.mubr.bf16.mxu0 %v201_v55  ;;  %895 = vmatprep.subr.bf16.mxu1 %v956_v56 }
  0x27   :  { %750 = vmatprep.mubr.bf16.mxu1 %v205_v58 }
  0x28   :  { %874 = vmatpush3.bf16.msra.mxu0 %v957_v57 }
  0x29   :  { %875 = vmatprep.subr.bf16.mxu0 %v959_v59  ;;  %896 = vmatpush3.bf16.msra.mxu1 %v958_v60 }
  0x2a   :  { %897 = vmatprep.subr.bf16.mxu1 %v960_v61 }
  0x2c   :  { %876 = vmatpush3.bf16.msra.mxu0 %v961_v62 }
  0x2d   :  { %877 = vmatprep.subr.bf16.mxu0 %v963_v63  ;;  %898 = vmatpush3.bf16.msra.mxu1 %v962_v0 }
  0x2e   :  { %899 = vmatprep.subr.bf16.mxu1 %v964_v1 }
  0x30   :  { %878 = vmatpush3.bf16.msra.mxu0 %v965_v2 }
  0x31   :  { %879 = vmatprep.subr.bf16.mxu0 %v967_v3  ;;  %900 = vmatpush3.bf16.msra.mxu1 %v966_v4 }
  0x32   :  { %901 = vmatprep.subr.bf16.mxu1 %v968_v5 }
  0x34   :  { %880 = vmatpush3.bf16.msra.mxu0 %v969_v6 }
  0x35   :  { %881 = vmatprep.subr.bf16.mxu0 %v971_v7  ;;  %902 = vmatpush3.bf16.msra.mxu1 %v970_v8 }
  0x36   :  { %903 = vmatprep.subr.bf16.mxu1 %v972_v9 }
  0x38   :  { %882 = vmatpush3.bf16.msra.mxu0 %v973_v10 }
  0x39   :  { %883 = vmatprep.subr.bf16.mxu0 %v975_v11  ;;  %904 = vmatpush3.bf16.msra.mxu1 %v974_v12 }
  0x3a   :  { %905 = vmatprep.subr.bf16.mxu1 %v976_v13 }
  0x3c   :  { %884 = vmatpush3.bf16.msra.mxu0 %v977_v14 }
  0x3d   :  { %885 = vmatprep.subr.bf16.mxu0 %v979_v15  ;;  %906 = vmatpush3.bf16.msra.mxu1 %v978_v16 }
  0x3e   :  { %907 = vmatprep.subr.bf16.mxu1 %v980_v17 }
  0x40   :  { %886 = vmatpush3.bf16.msra.mxu0 %v981_v19 }
  0x41   :  { %908 = vmatpush3.bf16.msra.mxu1 %v982_v21 }
  0x43   :  { %711 = vmatmul.mubr.bf16.vlgmr.msra.gmra.mrb[4].mxu0 %v187_v20 }
  0x44   :  { %751 = vmatmul.mubr.bf16.vlgmr.msra.gmra.mrb[4].mxu1 %v203_v22 }
  0x95   :  { %v150_v24 = vpop.permute.xlu0 %149 }
  0x96   :  { %v155_v26 = vrot.slane %v150_v24, %v154_v23 }
  0xf6   :  { %v843_v25 = vpop.f32.mrb[0].mxu0 }
  0xf7   :  { %v844_v27 = vpop.f32.mrb[1].mxu0  ;;  %v865_v28 = vpop.f32.mrb[0].mxu1 }
  0xf8   :  { %v845_v29 = vadd.f32 %v844_v27, %v843_v25  ;;  %v846_v30 = vpop.f32.mrb[2].mxu0  ;;  %v866_v32 = vpop.f32.mrb[1].mxu1 }
  0xf9   :  { %v847_v33 = vpop.f32.mrb[3].mxu0  ;;  %v867_v35 = vadd.f32 %v866_v32, %v865_v28  ;;  %v868_v36 = vpop.f32.mrb[2].mxu1 }
  0xfa   :  { %v633_v34 = vadd.f32 %v845_v29, %v155_v26  ;;  %v869_v37 = vpop.f32.mrb[3].mxu1 }
  0xfc   :  { %v673_v38 = vadd.f32 %v867_v35, %v633_v34 }
 0x116   :  { %v887_v39 = vpop.f32.mrb[4].mxu0 }
 0x117   :  { %v888_v40 = vpop.f32.mrb[5].mxu0  ;;  %v909_v41 = vpop.f32.mrb[4].mxu1 }
 0x118   :  { %v889_v42 = vadd.f32 %v888_v40, %v887_v39  ;;  %v890_v43 = vpop.f32.mrb[6].mxu0  ;;  %v910_v31 = vpop.f32.mrb[5].mxu1 }
 0x119   :  { %v891_v44 = vpop.f32.mrb[7].mxu0  ;;  %v911_v46 = vadd.f32 %v910_v31, %v909_v41  ;;  %v912_v47 = vpop.f32.mrb[6].mxu1 }
 0x11a   :  { %v713_v45 = vadd.f32 %v889_v42, %v673_v38  ;;  %v913_v48 = vpop.f32.mrb[7].mxu1 }
 0x11c   :  { %v753_v49 = vadd.f32 %v911_v46, %v713_v45 }
 0x11e   :  { %758 = vst [vmem:[%s1226_s3] sm:$0x1] %v753_v49 }

// kernel: fc_discriminator_forward.7
= control target key start
LH: loop header
LB: loop body
LE: loop exit
PB: predicated region body
PF: predicated region fallthrough
CT: control target
= control target key end

     0   :  { %8 = vsyncpa [#allocation3], 0  ;;  %s2439_s0 = inlined_call_operand.vmem [shape: f32[2,2,2], index: 0, kind: input, shape index: {}]   ;;  %s2440_s1 = inlined_call_operand.vmem [shape: f32[512,2], index: 1, kind: input, shape index: {}]   ;;  %s2441_s2 = inlined_call_operand.vmem [shape: f32[2,512], index: 2, kind: input, shape index: {}]   ;;  %s2442_s3 = inlined_call_operand.hbm [shape: f32[2,512,512], index: 3, kind: output, shape index: {}]  }
   0x1   :  { %10 = vsyncpa [#allocation3 + $0x1], 0  ;;  %s2000_s12 = smov 0   ;;  %s2002_s13 = smov 0  }
   0x2   :  { %s2004_s14 = smov 0   ;;  %s2006_s15 = smov 0  }
   0x3   :  { %s2008_s16 = smov 0   ;;  %s2010_s17 = smov 0  }
   0x4   :  { %s2012_s18 = smov 0   ;;  %s2014_s19 = smov 0  }
   0x5 LB: > { %s1368_s20 = sadd.s32 4294967295, %s1973_s19   ;;  %s1369_s21 = sadd.s32 4294967294, %s1973_s19   ;;  %s1973_s19 = sphi %s2014_s19, %s16_s19   ;;  %s1969_s18 = sphi %s2012_s18, %s2451_s18   ;;  %s1965_s17 = sphi %s2010_s17, %s2450_s17   ;;  %s1961_s16 = sphi %s2008_s16, %s2449_s16   ;;  %s1957_s15 = sphi %s2006_s15, %s2448_s15   ;;  %s1953_s14 = sphi %s2004_s14, %s2447_s14   ;;  %s1949_s13 = sphi %s2002_s13, %s2446_s13   ;;  %s1945_s12 = sphi %s2000_s12, %s2445_s12  }
   0x6   : > { %s25_s22 = sadd.s32 1, %s1965_s17  ;;  %s28_s23 = sadd.s32 1, %s1969_s18 }
   0x7   : > { %p26_p0 = scmp.ge.s32.totalorder %s25_s22, 4  ;;  %p120_p1 = scmp.ne.s32.totalorder %s1953_s14, %s1949_s13 }
   0x8   : > { %p121_p2 = scmp.eq.s32.totalorder %s1368_s20, 7  ;;  %p126_p5 = scmp.ne.s32.totalorder %s1949_s13, %s1945_s12 }
   0x9   : > { %s2453_s22 = smov (%p26_p0, %s25_s22), 0  ;;  %s2455_s23 = smov (!%p26_p0, %s28_s23), %s1969_s18 }
   0xa   : > { %s106_s24 = ssub.s32 %s1965_s17, %s2453_s22  ;;  %p2051_p3 = por %p121_p2, %p120_p1 }
   0xb   : > { %p30_p4 = scmp.ge.s32.totalorder %s2455_s23, 2  ;;  %p127_p6 = scmp.eq.s32.totalorder %s1369_s21, 7 }
   0xc   : > { %p1372_p7 = scmp.ge.s32.totalorder %s1973_s19, 1  ;;  %p164_p9 = scmp.lt.s32.totalorder %s1973_s19, 9 }
   0xd   : > { %s2457_s23 = smov (%p30_p4, %s2455_s23), 0  ;;  %p2060_p8 = por %p127_p6, %p126_p5 }
   0xe   : > { %s105_s27 = ssub.s32 %s1969_s18, %s2457_s23  ;;  %s110_s28 = sadd.s32 1, %s1953_s14 }
   0xf   : > { %s107_s29 = sor.u32 %s106_s24, %s105_s27  ;;  %p165_p10 = pnand %p1372_p7, %p164_p9 }
  0x10   : > { %p108_p11 = scmp.eq.s32.totalorder %s107_s29, 0  ;;  %p192_p12 = scmp.lt.s32.totalorder (!%p165_p10), %s1961_s16, 1  ;;  %v424_v0 = vlaneseq (!%p165_p10)  ;;  %v418_v1 = vld [vmem:[%s2441_s2] sm:$0xff] (!%p165_p10)  ;;  %v1975_v2 = vmov (!%p165_p10), 1983009808   ;;  %vm269_vm0 = vcmask (!%p165_p10), 1041408  }
  0x11   : > { %168 = sbr.rel (%p165_p10) target bundleno = 613 (0x265), region = 32  ;;  %s1375_s4 = sshll.u32 (!%p165_p10), %s1957_s15, 4  ;;  %v422_v3 = vunpack.c.l.s4 (!%p165_p10), %v1975_v2  ;;  %v420_v6 = vcombine.high (!%p165_p10), %v418_v1, %v418_v1  ;;  %vm220_vm1 = vcmask (!%p165_p10), 15360   ;;  %v1976_v29 = vmov (!%p165_p10), 0.0  }
  0x12   : > { %s2069_s30 = scalar_select %p108_p11, %s1953_s14, %s110_s28  }
  0x13   : > { %p197_p13 = scmp.lt.s32.totalorder (!%p165_p10), %s1375_s4, 63  ;;  %v425_v4 = vshrl.u32 (!%p165_p10), %v424_v0, 7  ;;  %v423_v5 = vunpack.c.0.s8 (!%p165_p10), %v422_v3  ;;  %s189_s28 = sand.u32 (!%p165_p10), 1, %s1949_s13  }
  0x14   : > { %s1373_s29 = sshll.u32 (!%p165_p10), %s189_s28, 9  ;;  %s1501_s5 = sshll.u32 (!%p165_p10), %s1957_s15, 6 }
  0x15   : > { %v426_v8 = vsub.s32 (!%p165_p10), %v423_v5, %v425_v4  ;;  %s1497_s6 = sshll.u32 (!%p165_p10), %s1961_s16, 8  ;;  %s1977_s21 = smov (!%p165_p10), [#allocation2]  }
  0x16   : > { %s1883_s24 = sshll.u32 (!%p165_p10), %s1977_s21, 4  ;;  %s1884_s24 = int_to_ptr.vmem [resolvable:$false] %s1883_s24 }
  0x17   : > { %v427_v12 = vrot.slane (!%p165_p10), %v418_v1, %v426_v8  ;;  %v434_v13 = vrot.slane (!%p165_p10), %v420_v6, %v426_v8 }
  0x18   : > { %s193_s7 = scalar_select %p192_p12, %s1961_s16, 1 }
  0x19   : > { %s2459_s4 = smov (!%p197_p13, %s1375_s4), 63  ;;  %v435_v18 = vcombine.high %v427_v12, %v427_v12  ;;  %v436_v19 = vcombine.high %v434_v13, %v434_v13 }
  0x1a   : > { %s1374_s8 = sshll.u32 %s193_s7, 1  ;;  %s1376_s20 = sshll.u32 %s2459_s4, 3 }
  0x1b   : > { %s195_s11 = scalar_lea.vmem %s2439_s0, %s1374_s8  ;;  %s2083_s27 = scalar_lea.vmem %s2440_s1, %s1376_s20 }
  0x1c   : > { %v203_v7 = vld [vmem:[%s195_s11] sm:$0x3]  ;;  %v205_v10 = vld [vmem:[%s2083_s27 + $0x8] sm:$0xff]  ;;  %v206_v11 = vld [vmem:[%s2083_s27 + $0x10] sm:$0xff]  ;;  %s2198_s4 = scalar_lea.vmem [#allocation2], %s1373_s29  ;;  %s1277_s7 = sadd.s32 %s1501_s5, %s1497_s6 }
  0x1d   : > { %1519 = vmatprep.subr.msk.mxu0 %vm269_vm0, %v203_v7  ;;  %v204_v9 = vld [vmem:[%s2083_s27] sm:$0xff]  ;;  %1545 = vmatprep.subr.msk.mxu1 %vm269_vm0, %v203_v7  ;;  %v207_v15 = vld [vmem:[%s2083_s27 + $0x18] sm:$0xff]  ;;  %v213_v16 = vld [vmem:[%s2083_s27 + $0x48] sm:$0xff]  ;;  %s1498_s15 = sshll.u32 %s1277_s7, 7  ;;  %s1280_s16 = sshll.u32 %s2198_s4, 4  ;;  %s2380_s16 = int_to_ptr.vmem [resolvable:$true] %s1280_s16 }
  0x1e   : > { %1520 = vmatpush3.msk.msra.mxu0 %vm269_vm0, %v203_v7  ;;  %1521 = vmatprep.mubr.msk.f32.mxu0 %vm220_vm1, %v204_v9  ;;  %v212_v14 = vld [vmem:[%s2083_s27 + $0x40] sm:$0xff]  ;;  %v214_v17 = vld [vmem:[%s2083_s27 + $0x50] sm:$0xff]  ;;  %v215_v21 = vld [vmem:[%s2083_s27 + $0x58] sm:$0xff]  ;;  %s2378_s10 = scalar_lea.hbm %s2442_s3, %s1498_s15  ;;  %s2387_s11 = scalar_lea.sflag [#allocation3], %s189_s28 }
  0x1f   : > { %1522 = vmatmul.mubr.msk.f32.vlgmr.msra.gmra.mrb[0].mxu0 %vm220_vm1, %v205_v10  ;;  %1546 = vmatpush3.msk.msra.mxu1 %vm269_vm0, %v203_v7  ;;  %v208_v20 = vld [vmem:[%s2083_s27 + $0x20] sm:$0xff]  ;;  %v209_v23 = vld [vmem:[%s2083_s27 + $0x28] sm:$0xff]  ;;  %v210_v24 = vld [vmem:[%s2083_s27 + $0x30] sm:$0xff]  ;;  %s1879_s20 = scalar_lea.vmem %s2380_s16, 8192  ;;  %p1886_p4 = scmp.lt.s32.totalorder %s2380_s16, %s1884_s24 }
  0x20   : > { %1524 = vmatprep.mubr.msk.f32.mxu0 %vm220_vm1, %v206_v11  ;;  %1533 = vmatprep.mubr.msk.f32.mxu1 %vm220_vm1, %v212_v14  ;;  %v216_v22 = vld [vmem:[%s2083_s27 + $0x60] sm:$0xff]  ;;  %v217_v25 = vld [vmem:[%s2083_s27 + $0x68] sm:$0xff]  ;;  %v218_v26 = vld [vmem:[%s2083_s27 + $0x70] sm:$0xff]  ;;  %p1880_p0 = scmp.ne.s32.totalorder %s2380_s16, %s1879_s20 }
  0x21   : > { %1534 = vmatmul.mubr.msk.f32.vlgmr.msra.gmra.mrb[0].mxu1 %vm220_vm1, %v213_v16  ;;  %1394 = vmatprep.subr.msk.mxu1 %vm269_vm0, %v435_v18  ;;  %v211_v27 = vld [vmem:[%s2083_s27 + $0x38] sm:$0xff] }
  0x22   : > { %1536 = vmatprep.mubr.msk.f32.mxu1 %vm220_vm1, %v214_v17  ;;  %1412 = vmatprep.subr.msk.mxu0 %vm269_vm0, %v436_v19  ;;  %v219_v28 = vld [vmem:[%s2083_s27 + $0x78] sm:$0xff]  ;;  %p1881_p1 = pnand %p1880_p0, %p2051_p3  ;;  %s1885_s27 = scalar_lea.vmem %s1884_s24, 16384 }
  0x23   : > { %1525 = vmatmul.mubr.msk.f32.gmra.mrb[2].mxu0 %vm220_vm1, %v207_v15  ;;  %1395 = vmatpush1.msk.msra.mxu1 %vm269_vm0, %v427_v12  ;;  %p1887_p5 = scmp.lt.s32.totalorder %s1885_s27, %s1879_s20 }
  0x24   : > { %1527 = vmatprep.mubr.msk.f32.mxu0 %vm220_vm1, %v208_v20  ;;  %1413 = vmatpush1.msk.msra.mxu0 %vm269_vm0, %v434_v13  ;;  %p1882_p2 = pneg %p1881_p1 }
  0x25   : > { %1537 = vmatmul.mubr.msk.f32.gmra.mrb[2].mxu1 %vm220_vm1, %v215_v21  ;;  %p1888_p6 = por %p1887_p5, %p1886_p4 }
  0x26   : > { %1539 = vmatprep.mubr.msk.f32.mxu1 %vm220_vm1, %v216_v22 }
  0x27   : > { %1528 = vmatmul.mubr.msk.f32.gmra.mrb[4].mxu0 %vm220_vm1, %v209_v23  ;;  %p1889_p7 = pnand %p1888_p6, %p1882_p2 }
  0x28   : > { %1530 = vmatprep.mubr.msk.f32.mxu0 %vm220_vm1, %v210_v24 }
  0x29   : > { %1540 = vmatmul.mubr.msk.f32.gmra.mrb[4].mxu1 %vm220_vm1, %v217_v25 }
  0x2a   : > { %1542 = vmatprep.mubr.msk.f32.mxu1 %vm220_vm1, %v218_v26 }
  0x2b   : > { %1531 = vmatmul.mubr.msk.f32.gmra.mrb[6].mxu0 %vm220_vm1, %v211_v27 }
  0x2c   : > { %718 = vmatprep.mubr.f32.mxu0 %v1976_v29 }
  0x2d   : > { %1543 = vmatmul.mubr.msk.f32.gmra.mrb[6].mxu1 %vm220_vm1, %v219_v28 }
  0x2e   : > { %557 = vmatprep.mubr.f32.mxu1 %v1976_v29 }
  0xf2   : > { %v1523_v30 = vpop.f32.mrb[0].mxu0 }
  0xf3   : > { %v339_v31 = vpop.f32.mrb[1].mxu0 }
  0xf4   : > { %1396 = vmatmul.mubr.msk.f32.vlgmr.msra.gmra.mrb[8].mxu1 %vm220_vm1, %v339_v31  ;;  %1414 = vmatmul.mubr.msk.f32.vlgmr.msra.gmra.mrb[8].mxu0 %vm220_vm1, %v339_v31  ;;  %v1535_v32 = vpop.f32.mrb[0].mxu1 }
  0xf5   : > { %563 = vmatprep.mubr.f32.mxu1 %v1976_v29  ;;  %724 = vmatprep.mubr.f32.mxu0 %v1976_v29  ;;  %v379_v33 = vpop.f32.mrb[1].mxu1 }
  0xf6   : > { %v1526_v34 = vpop.f32.mrb[2].mxu0 }
  0xf7   : > { %v349_v35 = vpop.f32.mrb[3].mxu0 }
  0xf8   : > { %1397 = vmatmul.mubr.msk.f32.gmra.mrb[10].mxu1 %vm220_vm1, %v1523_v30  ;;  %1415 = vmatmul.mubr.msk.f32.gmra.mrb[10].mxu0 %vm220_vm1, %v1523_v30  ;;  %v1538_v36 = vpop.f32.mrb[2].mxu1 }
  0xf9   : > { %569 = vmatprep.mubr.f32.mxu1 %v1976_v29  ;;  %730 = vmatprep.mubr.f32.mxu0 %v1976_v29  ;;  %v389_v37 = vpop.f32.mrb[3].mxu1 }
  0xfa   : > { %v1529_v38 = vpop.f32.mrb[4].mxu0 }
  0xfb   : > { %v359_v39 = vpop.f32.mrb[5].mxu0 }
  0xfc   : > { %1398 = vmatmul.mubr.msk.f32.gmra.mrb[12].mxu1 %vm220_vm1, %v349_v35  ;;  %1416 = vmatmul.mubr.msk.f32.gmra.mrb[12].mxu0 %vm220_vm1, %v349_v35  ;;  %v1541_v40 = vpop.f32.mrb[4].mxu1 }
  0xfd   : > { %575 = vmatprep.mubr.f32.mxu1 %v1976_v29  ;;  %736 = vmatprep.mubr.f32.mxu0 %v1976_v29  ;;  %v399_v41 = vpop.f32.mrb[5].mxu1 }
  0xfe   : > { %v1532_v42 = vpop.f32.mrb[6].mxu0 }
  0xff   : > { %v369_v43 = vpop.f32.mrb[7].mxu0 }
 0x100   : > { %1399 = vmatmul.mubr.msk.f32.gmra.mrb[14].mxu1 %vm220_vm1, %v1526_v34  ;;  %1417 = vmatmul.mubr.msk.f32.gmra.mrb[14].mxu0 %vm220_vm1, %v1526_v34  ;;  %v1544_v44 = vpop.f32.mrb[6].mxu1 }
 0x101   : > { %581 = vmatprep.mubr.f32.mxu1 %v1976_v29  ;;  %742 = vmatprep.mubr.f32.mxu0 %v1976_v29  ;;  %v409_v45 = vpop.f32.mrb[7].mxu1 }
 0x104   : > { %1400 = vmatmul.mubr.msk.f32.gmra.mrb[16].mxu1 %vm220_vm1, %v359_v39  ;;  %1418 = vmatmul.mubr.msk.f32.gmra.mrb[16].mxu0 %vm220_vm1, %v359_v39 }
 0x105   : > { %587 = vmatprep.mubr.f32.mxu1 %v1976_v29  ;;  %748 = vmatprep.mubr.f32.mxu0 %v1976_v29 }
 0x108   : > { %1401 = vmatmul.mubr.msk.f32.gmra.mrb[18].mxu1 %vm220_vm1, %v1529_v38  ;;  %1419 = vmatmul.mubr.msk.f32.gmra.mrb[18].mxu0 %vm220_vm1, %v1529_v38 }
 0x109   : > { %593 = vmatprep.mubr.f32.mxu1 %v1976_v29  ;;  %754 = vmatprep.mubr.f32.mxu0 %v1976_v29 }
 0x10c   : > { %1402 = vmatmul.mubr.msk.f32.gmra.mrb[20].mxu1 %vm220_vm1, %v369_v43  ;;  %1420 = vmatmul.mubr.msk.f32.gmra.mrb[20].mxu0 %vm220_vm1, %v369_v43 }
 0x10d   : > { %599 = vmatprep.mubr.f32.mxu1 %v1976_v29  ;;  %760 = vmatprep.mubr.f32.mxu0 %v1976_v29 }
 0x110   : > { %1403 = vmatmul.mubr.msk.f32.gmra.mrb[22].mxu1 %vm220_vm1, %v1532_v42  ;;  %1421 = vmatmul.mubr.msk.f32.gmra.mrb[22].mxu0 %vm220_vm1, %v1532_v42 }
 0x111   : > { %605 = vmatprep.mubr.f32.mxu1 %v1976_v29  ;;  %766 = vmatprep.mubr.f32.mxu0 %v1976_v29 }
 0x114   : > { %1404 = vmatmul.mubr.msk.f32.gmra.mrb[24].mxu1 %vm220_vm1, %v379_v33  ;;  %1422 = vmatmul.mubr.msk.f32.gmra.mrb[24].mxu0 %vm220_vm1, %v379_v33 }
 0x115   : > { %611 = vmatprep.mubr.f32.mxu1 %v1976_v29  ;;  %772 = vmatprep.mubr.f32.mxu0 %v1976_v29 }
 0x118   : > { %1405 = vmatmul.mubr.msk.f32.gmra.mrb[26].mxu1 %vm220_vm1, %v1535_v32  ;;  %1423 = vmatmul.mubr.msk.f32.gmra.mrb[26].mxu0 %vm220_vm1, %v1535_v32 }
 0x119   : > { %617 = vmatprep.mubr.f32.mxu1 %v1976_v29  ;;  %778 = vmatprep.mubr.f32.mxu0 %v1976_v29 }
 0x11c   : > { %1406 = vmatmul.mubr.msk.f32.gmra.mrb[28].mxu1 %vm220_vm1, %v389_v37  ;;  %1424 = vmatmul.mubr.msk.f32.gmra.mrb[28].mxu0 %vm220_vm1, %v389_v37 }
 0x11d   : > { %623 = vmatprep.mubr.f32.mxu1 %v1976_v29  ;;  %784 = vmatprep.mubr.f32.mxu0 %v1976_v29 }
 0x120   : > { %1407 = vmatmul.mubr.msk.f32.gmra.mrb[30].mxu1 %vm220_vm1, %v1538_v36  ;;  %1425 = vmatmul.mubr.msk.f32.gmra.mrb[30].mxu0 %vm220_vm1, %v1538_v36 }
 0x121   : > { %629 = vmatprep.mubr.f32.mxu1 %v1976_v29  ;;  %790 = vmatprep.mubr.f32.mxu0 %v1976_v29 }
 0x124   : > { %1408 = vmatmul.mubr.msk.f32.gmra.mrb[32].mxu1 %vm220_vm1, %v399_v41  ;;  %1426 = vmatmul.mubr.msk.f32.gmra.mrb[32].mxu0 %vm220_vm1, %v399_v41 }
 0x125   : > { %635 = vmatprep.mubr.f32.mxu1 %v1976_v29  ;;  %796 = vmatprep.mubr.f32.mxu0 %v1976_v29 }
 0x128   : > { %1409 = vmatmul.mubr.msk.f32.gmra.mrb[34].mxu1 %vm220_vm1, %v1541_v40  ;;  %1427 = vmatmul.mubr.msk.f32.gmra.mrb[34].mxu0 %vm220_vm1, %v1541_v40 }
 0x129   : > { %641 = vmatprep.mubr.f32.mxu1 %v1976_v29  ;;  %802 = vmatprep.mubr.f32.mxu0 %v1976_v29 }
 0x12c   : > { %1410 = vmatmul.mubr.msk.f32.gmra.mrb[36].mxu1 %vm220_vm1, %v409_v45  ;;  %1428 = vmatmul.mubr.msk.f32.gmra.mrb[36].mxu0 %vm220_vm1, %v409_v45 }
 0x12d   : > { %647 = vmatprep.mubr.f32.mxu1 %v1976_v29  ;;  %808 = vmatprep.mubr.f32.mxu0 %v1976_v29 }
 0x130   : > { %1411 = vmatmul.mubr.msk.f32.gmra.mrb[38].mxu1 %vm220_vm1, %v1544_v44  ;;  %1429 = vmatmul.mubr.msk.f32.gmra.mrb[38].mxu0 %vm220_vm1, %v1544_v44 }
 0x1c7   : > { %v559_v46 = vpop.f32.mrb[8].mxu1  ;;  %v720_v47 = vpop.f32.mrb[8].mxu0 }
 0x1c8   : > { %v1430_v48 = vmul.f32 -1.442695, %v559_v46  ;;  %v1432_v49 = vmul.f32 -1.442695, %v720_v47  ;;  %v561_v50 = vpop.f32.mrb[9].mxu1  ;;  %v722_v51 = vpop.f32.mrb[9].mxu0 }
 0x1c9   : > { %v1431_v52 = vmul.f32 -1.442695, %v561_v50  ;;  %v1433_v53 = vmul.f32 -1.442695, %v722_v51 }
 0x1ca   : > { %1623 = vpow2.f32 %v1430_v48 }
 0x1cb   : > { %1625 = vpow2.f32 %v1432_v49  ;;  %v565_v54 = vpop.f32.mrb[10].mxu1  ;;  %v726_v55 = vpop.f32.mrb[10].mxu0 }
 0x1cc   : > { %1627 = vpow2.f32 %v1431_v52  ;;  %v1434_v56 = vmul.f32 -1.442695, %v565_v54  ;;  %v1436_v57 = vmul.f32 -1.442695, %v726_v55  ;;  %v567_v58 = vpop.f32.mrb[11].mxu1  ;;  %v728_v59 = vpop.f32.mrb[11].mxu0 }
 0x1cd   : > { %1629 = vpow2.f32 %v1433_v53  ;;  %v1435_v60 = vmul.f32 -1.442695, %v567_v58  ;;  %v1437_v61 = vmul.f32 -1.442695, %v728_v59 }
 0x1ce   : > { %1631 = vpow2.f32 %v1434_v56 }
 0x1cf   : > { %1633 = vpow2.f32 %v1436_v57  ;;  %v571_v62 = vpop.f32.mrb[12].mxu1  ;;  %v732_v63 = vpop.f32.mrb[12].mxu0 }
 0x1d0   : > { %1635 = vpow2.f32 %v1435_v60  ;;  %v1438_v0 = vmul.f32 -1.442695, %v571_v62  ;;  %v1440_v1 = vmul.f32 -1.442695, %v732_v63  ;;  %v573_v2 = vpop.f32.mrb[13].mxu1  ;;  %v734_v3 = vpop.f32.mrb[13].mxu0 }
 0x1d1   : > { %1637 = vpow2.f32 %v1437_v61  ;;  %v1439_v4 = vmul.f32 -1.442695, %v573_v2  ;;  %v1441_v5 = vmul.f32 -1.442695, %v734_v3 }
 0x1d2   : > { %1639 = vpow2.f32 %v1438_v0 }
 0x1d3   : > { %1641 = vpow2.f32 %v1440_v1  ;;  %v577_v6 = vpop.f32.mrb[14].mxu1  ;;  %v738_v7 = vpop.f32.mrb[14].mxu0 }
 0x1d4   : > { %v1624_v8 = vpop.eup %1623  ;;  %1643 = vpow2.f32 %v1439_v4  ;;  %v1442_v9 = vmul.f32 -1.442695, %v577_v6  ;;  %v579_v10 = vpop.f32.mrb[15].mxu1  ;;  %v1444_v46 = vmul.f32 -1.442695, %v738_v7 }
 0x1d5   : > { %v740_v11 = vpop.f32.mrb[15].mxu0  ;;  %v1626_v12 = vpop.eup %1625  ;;  %v1007_v13 = vadd.f32 1.0, %v1624_v8  ;;  %1645 = vpow2.f32 %v1441_v5  ;;  %v1443_v50 = vmul.f32 -1.442695, %v579_v10 }
 0x1d6   : > { %v1628_v14 = vpop.eup %1627  ;;  %v1009_v15 = vadd.f32 1.0, %v1626_v12  ;;  %1647 = vpow2.f32 %v1442_v9  ;;  %v1445_v53 = vmul.f32 -1.442695, %v740_v11 }
 0x1d7   : > { %v1630_v16 = vpop.eup %1629  ;;  %1649 = vrcp.f32 %v1007_v13  ;;  %v1008_v17 = vadd.f32 1.0, %v1628_v14  ;;  %v583_v18 = vpop.f32.mrb[16].mxu1 }
 0x1d8   : > { %v744_v19 = vpop.f32.mrb[16].mxu0  ;;  %v1632_v20 = vpop.eup %1631  ;;  %1651 = vrcp.f32 %v1009_v15  ;;  %v1010_v21 = vadd.f32 1.0, %v1630_v16  ;;  %v1446_v55 = vmul.f32 -1.442695, %v583_v18 }
 0x1d9   : > { %v585_v22 = vpop.f32.mrb[17].mxu1  ;;  %v1634_v23 = vpop.eup %1633  ;;  %1653 = vrcp.f32 %v1008_v17  ;;  %v1011_v24 = vadd.f32 1.0, %v1632_v20  ;;  %v1448_v59 = vmul.f32 -1.442695, %v744_v19 }
 0x1da   : > { %v746_v25 = vpop.f32.mrb[17].mxu0  ;;  %v1636_v26 = vpop.eup %1635  ;;  %1655 = vrcp.f32 %v1010_v21  ;;  %v1013_v27 = vadd.f32 1.0, %v1634_v23  ;;  %v1447_v63 = vmul.f32 -1.442695, %v585_v22 }
 0x1db   : > { %v1638_v28 = vpop.eup %1637  ;;  %1657 = vrcp.f32 %v1011_v24  ;;  %v1012_v29 = vadd.f32 1.0, %v1636_v26  ;;  %v589_v30 = vpop.f32.mrb[18].mxu1  ;;  %v1449_v1 = vmul.f32 -1.442695, %v746_v25 }
 0x1dc   : > { %v750_v31 = vpop.f32.mrb[18].mxu0  ;;  %v1640_v32 = vpop.eup %1639  ;;  %1659 = vrcp.f32 %v1013_v27  ;;  %v1014_v33 = vadd.f32 1.0, %v1638_v28  ;;  %v1450_v3 = vmul.f32 -1.442695, %v589_v30 }
 0x1dd   : > { %v591_v34 = vpop.f32.mrb[19].mxu1  ;;  %v1642_v35 = vpop.eup %1641  ;;  %1661 = vrcp.f32 %v1012_v29  ;;  %v1015_v36 = vadd.f32 1.0, %v1640_v32  ;;  %v1452_v7 = vmul.f32 -1.442695, %v750_v31 }
 0x1de   : > { %v752_v37 = vpop.f32.mrb[19].mxu0  ;;  %v1644_v38 = vpop.eup %1643  ;;  %1663 = vrcp.f32 %v1014_v33  ;;  %v1017_v39 = vadd.f32 1.0, %v1642_v35  ;;  %v1451_v11 = vmul.f32 -1.442695, %v591_v34 }
 0x1df   : > { %v1646_v40 = vpop.eup %1645  ;;  %1665 = vrcp.f32 %v1015_v36  ;;  %v1016_v41 = vadd.f32 1.0, %v1644_v38  ;;  %v595_v42 = vpop.f32.mrb[20].mxu1  ;;  %v1453_v13 = vmul.f32 -1.442695, %v752_v37 }
 0x1e0   : > { %v2192_v43 = vpop.f32.mrb[20].mxu0  ;;  %v1648_v44 = vpop.eup %1647  ;;  %1667 = vrcp.f32 %v1017_v39  ;;  %v1018_v45 = vadd.f32 1.0, %v1646_v40  ;;  %v1454_v15 = vmul.f32 -1.442695, %v595_v42 }
 0x1e1   : > { %v2194_v47 = vpop.f32.mrb[21].mxu1  ;;  %v1650_v48 = vpop.eup %1649  ;;  %1669 = vrcp.f32 %v1016_v41  ;;  %v1019_v49 = vadd.f32 1.0, %v1648_v44  ;;  %v1456_v19 = vmul.f32 -1.442695, %v2192_v43 }
 0x1e2   : > { %v2196_v51 = vpop.f32.mrb[21].mxu0  ;;  %v1652_v52 = vpop.eup %1651  ;;  %1199 = vst [vmem:[%s2198_s4] sm:$0xff] %v1650_v48  ;;  %1671 = vrcp.f32 %v1018_v45 }
 0x1e3   : > { %v1654_v54 = vpop.eup %1653  ;;  %1201 = vst [vmem:[%s2198_s4 + $0x10] sm:$0xff] %v1652_v52  ;;  %1673 = vrcp.f32 %v1019_v49  ;;  %v2202_v56 = vpop.f32.mrb[22].mxu1 }
 0x1e4   : > { %v2204_v57 = vpop.f32.mrb[22].mxu0  ;;  %v1656_v58 = vpop.eup %1655  ;;  %1200 = vst [vmem:[%s2198_s4 + $0x8] sm:$0xff] %v1654_v54  ;;  %1675 = vpow2.f32 %v1444_v46 }
 0x1e5   : > { %v2207_v60 = vpop.f32.mrb[23].mxu1  ;;  %v2209_v61 = vpop.f32.mrb[23].mxu0  ;;  %1202 = vst [vmem:[%s2198_s4 + $0x18] sm:$0xff] %v1656_v58  ;;  %1677 = vpow2.f32 %v1443_v50 }
 0x1e6   : > { %v1658_v62 = vpop.eup %1657  ;;  %1679 = vpow2.f32 %v1445_v53 }
 0x1e7   : > { %v1660_v0 = vpop.eup %1659  ;;  %1203 = vst [vmem:[%s2198_s4 + $0x20] sm:$0xff] %v1658_v62  ;;  %1681 = vpow2.f32 %v1446_v55  ;;  %v2214_v4 = vpop.f32.mrb[24].mxu1 }
 0x1e8   : > { %v1662_v2 = vpop.eup %1661  ;;  %1205 = vst [vmem:[%s2198_s4 + $0x30] sm:$0xff] %v1660_v0  ;;  %v2216_v5 = vpop.f32.mrb[24].mxu0  ;;  %1683 = vpow2.f32 %v1448_v59 }
 0x1e9   : > { %v1664_v6 = vpop.eup %1663  ;;  %1204 = vst [vmem:[%s2198_s4 + $0x28] sm:$0xff] %v1662_v2  ;;  %v2219_v8 = vpop.f32.mrb[25].mxu1  ;;  %1685 = vpow2.f32 %v1447_v63  ;;  %v1455_v2 = vmul.f32 -1.442695, %v2194_v47 }
 0x1ea   : > { %v2221_v9 = vpop.f32.mrb[25].mxu0  ;;  %v1666_v10 = vpop.eup %1665  ;;  %1206 = vst [vmem:[%s2198_s4 + $0x38] sm:$0xff] %v1664_v6  ;;  %1687 = vpow2.f32 %v1449_v1 }
 0x1eb   : > { %v1668_v12 = vpop.eup %1667  ;;  %1207 = vst [vmem:[%s2198_s4 + $0x40] sm:$0xff] %v1666_v10  ;;  %1689 = vpow2.f32 %v1450_v3  ;;  %v2226_v16 = vpop.f32.mrb[26].mxu1 }
 0x1ec   : > { %v1670_v14 = vpop.eup %1669  ;;  %1209 = vst [vmem:[%s2198_s4 + $0x50] sm:$0xff] %v1668_v12  ;;  %v2228_v17 = vpop.f32.mrb[26].mxu0  ;;  %1691 = vpow2.f32 %v1452_v7  ;;  %v1457_v7 = vmul.f32 -1.442695, %v2196_v51  ;;  %v1460_v51 = vmul.f32 -1.442695, %v2204_v57 }
 0x1ed   : > { %v1672_v18 = vpop.eup %1671  ;;  %1208 = vst [vmem:[%s2198_s4 + $0x48] sm:$0xff] %v1670_v14  ;;  %v2232_v20 = vpop.f32.mrb[27].mxu1  ;;  %1693 = vpow2.f32 %v1451_v11  ;;  %v1462_v57 = vmul.f32 -1.442695, %v2214_v4  ;;  %v1465_v4 = vmul.f32 -1.442695, %v2221_v9 }
 0x1ee   : > { %v2234_v21 = vpop.f32.mrb[27].mxu0  ;;  %v1674_v22 = vpop.eup %1673  ;;  %1210 = vst [vmem:[%s2198_s4 + $0x58] sm:$0xff] %v1672_v18  ;;  %1695 = vpow2.f32 %v1453_v13  ;;  %v1458_v13 = vmul.f32 -1.442695, %v2202_v56  ;;  %v1461_v56 = vmul.f32 -1.442695, %v2209_v61 }
 0x1ef   : > { %v1676_v23 = vpop.eup %1675  ;;  %1211 = vst [vmem:[%s2198_s4 + $0x60] sm:$0xff] %v1674_v22  ;;  %1697 = vpow2.f32 %v1454_v15  ;;  %v2238_v26 = vpop.f32.mrb[28].mxu1  ;;  %v1464_v61 = vmul.f32 -1.442695, %v2216_v5  ;;  %v1466_v5 = vmul.f32 -1.442695, %v2226_v16 }
 0x1f0   : > { %v1678_v24 = vpop.eup %1677  ;;  %v1021_v25 = vadd.f32 1.0, %v1676_v23  ;;  %v2240_v27 = vpop.f32.mrb[28].mxu0  ;;  %1699 = vpow2.f32 %v1456_v19  ;;  %v1459_v19 = vmul.f32 -1.442695, %v2207_v60  ;;  %v1468_v9 = vmul.f32 -1.442695, %v2228_v17 }
 0x1f1   : > { %v1680_v28 = vpop.eup %1679  ;;  %v1020_v29 = vadd.f32 1.0, %v1678_v24  ;;  %v2242_v30 = vpop.f32.mrb[29].mxu1 }
 0x1f2   : > { %v1682_v31 = vpop.eup %1681  ;;  %1701 = vrcp.f32 %v1021_v25  ;;  %v1022_v32 = vadd.f32 1.0, %v1680_v28  ;;  %v2244_v33 = vpop.f32.mrb[29].mxu0 }
 0x1f3   : > { %v1684_v34 = vpop.eup %1683  ;;  %1703 = vrcp.f32 %v1020_v29  ;;  %v1023_v35 = vadd.f32 1.0, %v1682_v31  ;;  %v2246_v38 = vpop.f32.mrb[30].mxu1 }
 0x1f4   : > { %v1686_v36 = vpop.eup %1685  ;;  %1705 = vrcp.f32 %v1022_v32  ;;  %v1025_v37 = vadd.f32 1.0, %v1684_v34  ;;  %v2248_v39 = vpop.f32.mrb[30].mxu0  ;;  %v1463_v32 = vmul.f32 -1.442695, %v2219_v8 }
 0x1f5   : > { %v1688_v40 = vpop.eup %1687  ;;  %1707 = vrcp.f32 %v1023_v35  ;;  %v1024_v41 = vadd.f32 1.0, %v1686_v36  ;;  %v2250_v42 = vpop.f32.mrb[31].mxu1 }
 0x1f6   : > { %v1690_v43 = vpop.eup %1689  ;;  %1709 = vrcp.f32 %v1025_v37  ;;  %v1026_v44 = vadd.f32 1.0, %v1688_v40  ;;  %v2252_v45 = vpop.f32.mrb[31].mxu0 }
 0x1f7   : > { %v1692_v46 = vpop.eup %1691  ;;  %1711 = vrcp.f32 %v1024_v41  ;;  %v1027_v48 = vadd.f32 1.0, %v1690_v43  ;;  %v2254_v52 = vpop.f32.mrb[32].mxu1 }
 0x1f8   : > { %v1694_v49 = vpop.eup %1693  ;;  %1713 = vrcp.f32 %v1026_v44  ;;  %v1029_v50 = vadd.f32 1.0, %v1692_v46  ;;  %v2256_v53 = vpop.f32.mrb[32].mxu0  ;;  %v1467_v44 = vmul.f32 -1.442695, %v2232_v20 }
 0x1f9   : > { %v1696_v54 = vpop.eup %1695  ;;  %1715 = vrcp.f32 %v1027_v48  ;;  %v1028_v55 = vadd.f32 1.0, %v1694_v49  ;;  %v2258_v58 = vpop.f32.mrb[33].mxu1 }
 0x1fa   : > { %v1698_v59 = vpop.eup %1697  ;;  %1717 = vrcp.f32 %v1029_v50  ;;  %v1030_v62 = vadd.f32 1.0, %v1696_v54  ;;  %v2260_v63 = vpop.f32.mrb[33].mxu0 }
 0x1fb   : > { %v1700_v0 = vpop.eup %1699  ;;  %1719 = vrcp.f32 %v1028_v55  ;;  %v1031_v1 = vadd.f32 1.0, %v1698_v59  ;;  %v2264_v10 = vpop.f32.mrb[34].mxu1 }
 0x1fc   : > { %v1702_v3 = vpop.eup %1701  ;;  %1721 = vrcp.f32 %v1030_v62  ;;  %v1033_v6 = vadd.f32 1.0, %v1700_v0  ;;  %v2266_v11 = vpop.f32.mrb[34].mxu0 }
 0x1fd   : > { %v1704_v12 = vpop.eup %1703  ;;  %1213 = vst [vmem:[%s2198_s4 + $0x70] sm:$0xff] %v1702_v3  ;;  %1723 = vrcp.f32 %v1031_v1  ;;  %v2270_v14 = vpop.f32.mrb[35].mxu1 }
 0x1fe   : > { %v2272_v15 = vpop.f32.mrb[35].mxu0  ;;  %v1706_v47 = vpop.eup %1705  ;;  %1212 = vst [vmem:[%s2198_s4 + $0x68] sm:$0xff] %v1704_v12  ;;  %1725 = vrcp.f32 %v1033_v6 }
 0x1ff   : > { %v1708_v18 = vpop.eup %1707  ;;  %1214 = vst [vmem:[%s2198_s4 + $0x78] sm:$0xff] %v1706_v47  ;;  %1727 = vpow2.f32 %v1455_v2  ;;  %v2280_v23 = vpop.f32.mrb[36].mxu1 }
 0x200   : > { %v1710_v22 = vpop.eup %1709  ;;  %1215 = vst [vmem:[%s2198_s4 + $0x80] sm:$0xff] %v1708_v18  ;;  %1729 = vpow2.f32 %v1457_v7  ;;  %v2282_v24 = vpop.f32.mrb[36].mxu0 }
 0x201   : > { %v1712_v25 = vpop.eup %1711  ;;  %1217 = vst [vmem:[%s2198_s4 + $0x90] sm:$0xff] %v1710_v22  ;;  %1731 = vpow2.f32 %v1458_v13  ;;  %v2286_v28 = vpop.f32.mrb[37].mxu1 }
 0x202   : > { %v2288_v29 = vpop.f32.mrb[37].mxu0  ;;  %v1714_v60 = vpop.eup %1713  ;;  %1216 = vst [vmem:[%s2198_s4 + $0x88] sm:$0xff] %v1712_v25  ;;  %1733 = vpow2.f32 %v1460_v51 }
 0x203   : > { %v1716_v31 = vpop.eup %1715  ;;  %1218 = vst [vmem:[%s2198_s4 + $0x98] sm:$0xff] %v1714_v60  ;;  %1735 = vpow2.f32 %v1459_v19  ;;  %v2296_v35 = vpop.f32.mrb[38].mxu1 }
 0x204   : > { %v1718_v34 = vpop.eup %1717  ;;  %1219 = vst [vmem:[%s2198_s4 + $0xa0] sm:$0xff] %v1716_v31  ;;  %1737 = vpow2.f32 %v1461_v56  ;;  %v2298_v36 = vpop.f32.mrb[38].mxu0  ;;  %v1470_v31 = vmul.f32 -1.442695, %v2238_v26  ;;  %v1474_v26 = vmul.f32 -1.442695, %v2246_v38 }
 0x205   : > { %v1720_v37 = vpop.eup %1719  ;;  %1221 = vst [vmem:[%s2198_s4 + $0xb0] sm:$0xff] %v1718_v34  ;;  %1739 = vpow2.f32 %v1462_v57  ;;  %v2302_v40 = vpop.f32.mrb[39].mxu1  ;;  %v1469_v57 = vmul.f32 -1.442695, %v2234_v21  ;;  %v1472_v34 = vmul.f32 -1.442695, %v2240_v27 }
 0x206   : > { %v2304_v8 = vpop.f32.mrb[39].mxu0  ;;  %v1722_v41 = vpop.eup %1721  ;;  %1220 = vst [vmem:[%s2198_s4 + $0xa8] sm:$0xff] %v1720_v37  ;;  %1741 = vpow2.f32 %v1464_v61  ;;  %v1471_v37 = vmul.f32 -1.442695, %v2242_v30  ;;  %v1473_v21 = vmul.f32 -1.442695, %v2244_v33 }
 0x207   : > { %v1724_v43 = vpop.eup %1723  ;;  %1222 = vst [vmem:[%s2198_s4 + $0xb8] sm:$0xff] %v1722_v41  ;;  %1743 = vpow2.f32 %v1463_v32  ;;  %v1476_v27 = vmul.f32 -1.442695, %v2248_v39  ;;  %v1475_v30 = vmul.f32 -1.442695, %v2250_v42 }
 0x208   : > { %v1726_v46 = vpop.eup %1725  ;;  %1223 = vst [vmem:[%s2198_s4 + $0xc0] sm:$0xff] %v1724_v43  ;;  %1745 = vpow2.f32 %v1465_v4  ;;  %v1477_v33 = vmul.f32 -1.442695, %v2252_v45  ;;  %v1478_v38 = vmul.f32 -1.442695, %v2254_v52 }
 0x209   : > { %v1728_v48 = vpop.eup %1727  ;;  %1225 = vst [vmem:[%s2198_s4 + $0xd0] sm:$0xff] %v1726_v46  ;;  %1747 = vpow2.f32 %v1466_v5  ;;  %v1480_v39 = vmul.f32 -1.442695, %v2256_v53  ;;  %v1479_v42 = vmul.f32 -1.442695, %v2258_v58 }
 0x20a   : > { %v1730_v16 = vpop.eup %1729  ;;  %v1032_v49 = vadd.f32 1.0, %v1728_v48  ;;  %1749 = vpow2.f32 %v1468_v9  ;;  %v1481_v45 = vmul.f32 -1.442695, %v2260_v63 }
 0x20b   : > { %v1732_v50 = vpop.eup %1731  ;;  %v1034_v54 = vadd.f32 1.0, %v1730_v16  ;;  %1751 = vpow2.f32 %v1467_v44 }
 0x20c   : > { %v1734_v55 = vpop.eup %1733  ;;  %1753 = vrcp.f32 %v1032_v49  ;;  %v1035_v17 = vadd.f32 1.0, %v1732_v50 }
 0x20d   : > { %v1736_v59 = vpop.eup %1735  ;;  %1755 = vrcp.f32 %v1034_v54  ;;  %v1037_v62 = vadd.f32 1.0, %v1734_v55 }
 0x20e   : > { %v1738_v0 = vpop.eup %1737  ;;  %1757 = vrcp.f32 %v1035_v17  ;;  %v1036_v20 = vadd.f32 1.0, %v1736_v59 }
 0x20f   : > { %v1740_v1 = vpop.eup %1739  ;;  %1759 = vrcp.f32 %v1037_v62  ;;  %v1038_v2 = vadd.f32 1.0, %v1738_v0 }
 0x210   : > { %v1742_v3 = vpop.eup %1741  ;;  %1761 = vrcp.f32 %v1036_v20  ;;  %v1039_v6 = vadd.f32 1.0, %v1740_v1 }
 0x211   : > { %v1744_v7 = vpop.eup %1743  ;;  %1763 = vrcp.f32 %v1038_v2  ;;  %v1041_v12 = vadd.f32 1.0, %v1742_v3 }
 0x212   : > { %v1746_v13 = vpop.eup %1745  ;;  %1765 = vrcp.f32 %v1039_v6  ;;  %v1040_v47 = vadd.f32 1.0, %v1744_v7 }
 0x213   : > { %v1748_v51 = vpop.eup %1747  ;;  %1767 = vrcp.f32 %v1041_v12  ;;  %v1042_v18 = vadd.f32 1.0, %v1746_v13 }
 0x214   : > { %v1750_v19 = vpop.eup %1749  ;;  %1769 = vrcp.f32 %v1040_v47  ;;  %v1043_v22 = vadd.f32 1.0, %v1748_v51 }
 0x215   : > { %v1752_v56 = vpop.eup %1751  ;;  %1771 = vrcp.f32 %v1042_v18  ;;  %v1045_v25 = vadd.f32 1.0, %v1750_v19 }
 0x216   : > { %v1754_v60 = vpop.eup %1753  ;;  %1773 = vrcp.f32 %v1043_v22  ;;  %v1044_v61 = vadd.f32 1.0, %v1752_v56 }
 0x217   : > { %v1756_v32 = vpop.eup %1755  ;;  %1224 = vst [vmem:[%s2198_s4 + $0xc8] sm:$0xff] %v1754_v60  ;;  %1775 = vrcp.f32 %v1045_v25 }
 0x218   : > { %v1758_v4 = vpop.eup %1757  ;;  %1226 = vst [vmem:[%s2198_s4 + $0xd8] sm:$0xff] %v1756_v32  ;;  %1777 = vrcp.f32 %v1044_v61 }
 0x219   : > { %v1760_v5 = vpop.eup %1759  ;;  %1227 = vst [vmem:[%s2198_s4 + $0xe0] sm:$0xff] %v1758_v4  ;;  %1779 = vpow2.f32 %v1469_v57  ;;  %v1482_v57 = vmul.f32 -1.442695, %v2264_v10  ;;  %v1486_v10 = vmul.f32 -1.442695, %v2280_v23 }
 0x21a   : > { %v1762_v41 = vpop.eup %1761  ;;  %1229 = vst [vmem:[%s2198_s4 + $0xf0] sm:$0xff] %v1760_v5  ;;  %1781 = vpow2.f32 %v1470_v31  ;;  %v1484_v31 = vmul.f32 -1.442695, %v2266_v11  ;;  %v1488_v11 = vmul.f32 -1.442695, %v2282_v24 }
 0x21b   : > { %v1764_v9 = vpop.eup %1763  ;;  %1228 = vst [vmem:[%s2198_s4 + $0xe8] sm:$0xff] %v1762_v41  ;;  %1783 = vpow2.f32 %v1472_v34  ;;  %v1483_v34 = vmul.f32 -1.442695, %v2270_v14  ;;  %v1487_v14 = vmul.f32 -1.442695, %v2286_v28 }
 0x21c   : > { %v1766_v43 = vpop.eup %1765  ;;  %1230 = vst [vmem:[%s2198_s4 + $0xf8] sm:$0xff] %v1764_v9  ;;  %1785 = vpow2.f32 %v1471_v37  ;;  %v1485_v37 = vmul.f32 -1.442695, %v2272_v15  ;;  %v1489_v15 = vmul.f32 -1.442695, %v2288_v29 }
 0x21d   : > { %v1768_v44 = vpop.eup %1767  ;;  %1231 = vst [vmem:[%s2198_s4 + $0x100] sm:$0xff] %v1766_v43  ;;  %1787 = vpow2.f32 %v1473_v21  ;;  %v1490_v23 = vmul.f32 -1.442695, %v2296_v35  ;;  %v1492_v24 = vmul.f32 -1.442695, %v2298_v36 }
 0x21e   : > { %v1770_v46 = vpop.eup %1769  ;;  %1233 = vst [vmem:[%s2198_s4 + $0x110] sm:$0xff] %v1768_v44  ;;  %1789 = vpow2.f32 %v1474_v26  ;;  %v1491_v43 = vmul.f32 -1.442695, %v2302_v40  ;;  %v1493_v29 = vmul.f32 -1.442695, %v2304_v8 }
 0x21f   : > { %v1772_v48 = vpop.eup %1771  ;;  %1232 = vst [vmem:[%s2198_s4 + $0x108] sm:$0xff] %v1770_v46  ;;  %1791 = vpow2.f32 %v1476_v27 }
 0x220   : > { %v1774_v16 = vpop.eup %1773  ;;  %1234 = vst [vmem:[%s2198_s4 + $0x118] sm:$0xff] %v1772_v48  ;;  %1793 = vpow2.f32 %v1475_v30 }
 0x221   : > { %v1776_v49 = vpop.eup %1775  ;;  %1235 = vst [vmem:[%s2198_s4 + $0x120] sm:$0xff] %v1774_v16  ;;  %1795 = vpow2.f32 %v1477_v33 }
 0x222   : > { %v1778_v50 = vpop.eup %1777  ;;  %1237 = vst [vmem:[%s2198_s4 + $0x130] sm:$0xff] %v1776_v49  ;;  %1797 = vpow2.f32 %v1478_v38 }
 0x223   : > { %v1780_v52 = vpop.eup %1779  ;;  %1236 = vst [vmem:[%s2198_s4 + $0x128] sm:$0xff] %v1778_v50  ;;  %1799 = vpow2.f32 %v1480_v39 }
 0x224   : > { %v1782_v54 = vpop.eup %1781  ;;  %v1046_v55 = vadd.f32 1.0, %v1780_v52  ;;  %1801 = vpow2.f32 %v1479_v42 }
 0x225   : > { %v1784_v53 = vpop.eup %1783  ;;  %v1047_v17 = vadd.f32 1.0, %v1782_v54  ;;  %1803 = vpow2.f32 %v1481_v45 }
 0x226   : > { %v1786_v59 = vpop.eup %1785  ;;  %1805 = vrcp.f32 %v1046_v55  ;;  %v1049_v58 = vadd.f32 1.0, %v1784_v53 }
 0x227   : > { %v1788_v62 = vpop.eup %1787  ;;  %1807 = vrcp.f32 %v1047_v17  ;;  %v1048_v0 = vadd.f32 1.0, %v1786_v59 }
 0x228   : > { %v1790_v20 = vpop.eup %1789  ;;  %1809 = vrcp.f32 %v1049_v58  ;;  %v1050_v63 = vadd.f32 1.0, %v1788_v62 }
 0x229   : > { %v1792_v1 = vpop.eup %1791  ;;  %1811 = vrcp.f32 %v1048_v0  ;;  %v1051_v2 = vadd.f32 1.0, %v1790_v20 }
 0x22a   : > { %v1794_v3 = vpop.eup %1793  ;;  %1813 = vrcp.f32 %v1050_v63  ;;  %v1053_v6 = vadd.f32 1.0, %v1792_v1 }
 0x22b   : > { %v1796_v7 = vpop.eup %1795  ;;  %1815 = vrcp.f32 %v1051_v2  ;;  %v1052_v12 = vadd.f32 1.0, %v1794_v3 }
 0x22c   : > { %v1798_v13 = vpop.eup %1797  ;;  %1817 = vrcp.f32 %v1053_v6  ;;  %v1054_v47 = vadd.f32 1.0, %v1796_v7 }
 0x22d   : > { %v1800_v51 = vpop.eup %1799  ;;  %1819 = vrcp.f32 %v1052_v12  ;;  %v1055_v18 = vadd.f32 1.0, %v1798_v13 }
 0x22e   : > { %v1802_v19 = vpop.eup %1801  ;;  %1821 = vrcp.f32 %v1054_v47  ;;  %v1057_v22 = vadd.f32 1.0, %v1800_v51 }
 0x22f   : > { %v1804_v56 = vpop.eup %1803  ;;  %1823 = vrcp.f32 %v1055_v18  ;;  %v1056_v25 = vadd.f32 1.0, %v1802_v19 }
 0x230   : > { %v1806_v60 = vpop.eup %1805  ;;  %1825 = vrcp.f32 %v1057_v22  ;;  %v1058_v61 = vadd.f32 1.0, %v1804_v56 }
 0x231   : > { %v1808_v32 = vpop.eup %1807  ;;  %1238 = vst [vmem:[%s2198_s4 + $0x138] sm:$0xff] %v1806_v60  ;;  %1827 = vrcp.f32 %v1056_v25 }
 0x232   : > { %v1810_v4 = vpop.eup %1809  ;;  %1239 = vst [vmem:[%s2198_s4 + $0x140] sm:$0xff] %v1808_v32  ;;  %1829 = vrcp.f32 %v1058_v61 }
 0x233   : > { %v1812_v5 = vpop.eup %1811  ;;  %1241 = vst [vmem:[%s2198_s4 + $0x150] sm:$0xff] %v1810_v4  ;;  %1831 = vpow2.f32 %v1482_v57 }
 0x234   : > { %v1814_v21 = vpop.eup %1813  ;;  %1240 = vst [vmem:[%s2198_s4 + $0x148] sm:$0xff] %v1812_v5  ;;  %1833 = vpow2.f32 %v1484_v31 }
 0x235   : > { %v1816_v41 = vpop.eup %1815  ;;  %1242 = vst [vmem:[%s2198_s4 + $0x158] sm:$0xff] %v1814_v21  ;;  %1835 = vpow2.f32 %v1483_v34 }
 0x236   : > { %v1818_v26 = vpop.eup %1817  ;;  %1243 = vst [vmem:[%s2198_s4 + $0x160] sm:$0xff] %v1816_v41  ;;  %1837 = vpow2.f32 %v1485_v37 }
 0x237   : > { %v1820_v9 = vpop.eup %1819  ;;  %1245 = vst [vmem:[%s2198_s4 + $0x170] sm:$0xff] %v1818_v26  ;;  %1839 = vpow2.f32 %v1486_v10 }
 0x238   : > { %v1822_v27 = vpop.eup %1821  ;;  %1244 = vst [vmem:[%s2198_s4 + $0x168] sm:$0xff] %v1820_v9  ;;  %1841 = vpow2.f32 %v1488_v11 }
 0x239   : > { %v1824_v28 = vpop.eup %1823  ;;  %1246 = vst [vmem:[%s2198_s4 + $0x178] sm:$0xff] %v1822_v27  ;;  %1843 = vpow2.f32 %v1487_v14 }
 0x23a   : > { %v1826_v30 = vpop.eup %1825  ;;  %1247 = vst [vmem:[%s2198_s4 + $0x180] sm:$0xff] %v1824_v28  ;;  %1845 = vpow2.f32 %v1489_v15 }
 0x23b   : > { %v1828_v44 = vpop.eup %1827  ;;  %1249 = vst [vmem:[%s2198_s4 + $0x190] sm:$0xff] %v1826_v30  ;;  %1847 = vpow2.f32 %v1490_v23 }
 0x23c   : > { %v1830_v35 = vpop.eup %1829  ;;  %1248 = vst [vmem:[%s2198_s4 + $0x188] sm:$0xff] %v1828_v44  ;;  %1849 = vpow2.f32 %v1492_v24 }
 0x23d   : > { %v1832_v33 = vpop.eup %1831  ;;  %1250 = vst [vmem:[%s2198_s4 + $0x198] sm:$0xff] %v1830_v35  ;;  %1851 = vpow2.f32 %v1491_v43 }
 0x23e   : > { %v1834_v36 = vpop.eup %1833  ;;  %v1059_v46 = vadd.f32 1.0, %v1832_v33  ;;  %1853 = vpow2.f32 %v1493_v29 }
 0x23f   : > { %v1836_v38 = vpop.eup %1835  ;;  %v1061_v48 = vadd.f32 1.0, %v1834_v36 }
 0x240   : > { %v1838_v40 = vpop.eup %1837  ;;  %1855 = vrcp.f32 %v1059_v46  ;;  %v1060_v39 = vadd.f32 1.0, %v1836_v38 }
 0x241   : > { %v1840_v16 = vpop.eup %1839  ;;  %1857 = vrcp.f32 %v1061_v48  ;;  %v1062_v8 = vadd.f32 1.0, %v1838_v40 }
 0x242   : > { %v1842_v42 = vpop.eup %1841  ;;  %1859 = vrcp.f32 %v1060_v39  ;;  %v1063_v49 = vadd.f32 1.0, %v1840_v16 }
 0x243   : > { %v1844_v45 = vpop.eup %1843  ;;  %1861 = vrcp.f32 %v1062_v8  ;;  %v1065_v50 = vadd.f32 1.0, %v1842_v42 }
 0x244   : > { %v1846_v52 = vpop.eup %1845  ;;  %1863 = vrcp.f32 %v1063_v49  ;;  %v1064_v54 = vadd.f32 1.0, %v1844_v45 }
 0x245   : > { %v1848_v55 = vpop.eup %1847  ;;  %1865 = vrcp.f32 %v1065_v50  ;;  %v1066_v53 = vadd.f32 1.0, %v1846_v52 }
 0x246   : > { %v1850_v17 = vpop.eup %1849  ;;  %1867 = vrcp.f32 %v1064_v54  ;;  %v1067_v59 = vadd.f32 1.0, %v1848_v55 }
 0x247   : > { %v1852_v58 = vpop.eup %1851  ;;  %1869 = vrcp.f32 %v1066_v53  ;;  %v1069_v62 = vadd.f32 1.0, %v1850_v17 }
 0x248   : > { %v1854_v0 = vpop.eup %1853  ;;  %1871 = vrcp.f32 %v1067_v59  ;;  %v1068_v20 = vadd.f32 1.0, %v1852_v58 }
 0x249   : > { %1873 = vrcp.f32 %v1069_v62  ;;  %v1070_v63 = vadd.f32 1.0, %v1854_v0 }
 0x24a   : > { %v1856_v1 = vpop.eup %1855  ;;  %1875 = vrcp.f32 %v1068_v20 }
 0x24b   : > { %v1858_v2 = vpop.eup %1857  ;;  %1251 = vst [vmem:[%s2198_s4 + $0x1a0] sm:$0xff] %v1856_v1  ;;  %1877 = vrcp.f32 %v1070_v63 }
 0x24c   : > { %v1860_v3 = vpop.eup %1859  ;;  %1253 = vst [vmem:[%s2198_s4 + $0x1b0] sm:$0xff] %v1858_v2 }
 0x24d   : > { %v1862_v6 = vpop.eup %1861  ;;  %1252 = vst [vmem:[%s2198_s4 + $0x1a8] sm:$0xff] %v1860_v3 }
 0x24e   : > { %v1864_v7 = vpop.eup %1863  ;;  %1254 = vst [vmem:[%s2198_s4 + $0x1b8] sm:$0xff] %v1862_v6 }
 0x24f   : > { %v1866_v12 = vpop.eup %1865  ;;  %1255 = vst [vmem:[%s2198_s4 + $0x1c0] sm:$0xff] %v1864_v7 }
 0x250   : > { %v1868_v13 = vpop.eup %1867  ;;  %1257 = vst [vmem:[%s2198_s4 + $0x1d0] sm:$0xff] %v1866_v12 }
 0x251   : > { %v1870_v47 = vpop.eup %1869  ;;  %1256 = vst [vmem:[%s2198_s4 + $0x1c8] sm:$0xff] %v1868_v13 }
 0x252   : > { %v1872_v51 = vpop.eup %1871  ;;  %1258 = vst [vmem:[%s2198_s4 + $0x1d8] sm:$0xff] %v1870_v47 }
 0x253   : > { %v1874_v18 = vpop.eup %1873  ;;  %1259 = vst [vmem:[%s2198_s4 + $0x1e0] sm:$0xff] %v1872_v51 }
 0x254   : > { %v1876_v19 = vpop.eup %1875  ;;  %1261 = vst [vmem:[%s2198_s4 + $0x1f0] sm:$0xff] %v1874_v18 }
 0x255   : > { %v1878_v22 = vpop.eup %1877  ;;  %1260 = vst [vmem:[%s2198_s4 + $0x1e8] sm:$0xff] %v1876_v19 }
 0x256   : > { %1262 = vst [vmem:[%s2198_s4 + $0x1f8] sm:$0xff] %v1878_v22 }
 0x257   : > { %1892 = shalt.err (!%p1889_p7)
}
 0x258   : > { %s1893_s28 = scalar_lea.hbm %s2378_s10, 8192  ;;  %s1897_s5 = scalar_lea.hbm %s2442_s3, 65536 }
 0x259   : > { %p1894_p9 = scmp.ne.s32.totalorder %s2378_s10, %s1893_s28  ;;  %p1898_p12 = scmp.lt.u32.totalorder %s2378_s10, %s2442_s3 }
 0x25a   : > { %p1899_p13 = scmp.lt.u32.totalorder %s1897_s5, %s1893_s28  ;;  %p1901_p1 = scmp.lt.u32.totalorder %s1893_s28, %s2378_s10 }
 0x25b   : > { %p1895_p10 = pnand %p1894_p9, %p2051_p3 }
 0x25c   : > { %p1900_p0 = por %p1899_p13, %p1898_p12 }
 0x25d   : > { %p1896_p11 = pneg %p1895_p10 }
 0x25e   : > { %p1902_p2 = por %p1901_p1, %p1900_p0 }
 0x260   : > { %p1903_p4 = pnand %p1902_p2, %p1896_p11 }
 0x262   : > { %1906 = shalt.err (!%p1903_p4)
}
 0x263   : > { %s1978_s15 = smov 512   ;;  %s1979_s8 = smov 32  }
 0x264   : > { %1547 = dma.vmem_to_hbm [thread:$0]  (%p2051_p3), %s2380_s16, 8192, %s2378_s10, %s2387_s11, %s1978_s15, %s1978_s15, %s1979_s8  }
 0x265 PF: > { %p1553_p5 = scmp.ge.s32.totalorder %s1973_s19, 2  ;;  %s1295_s9 = sand.u32 1, %s1945_s12  }
 0x266   : > { %s1296_s20 = scalar_lea.sflag [#allocation3], %s1295_s9 }
 0x267   : > { %p1550_p6 = pnand %p1553_p5, %p2060_p8 }
 0x269   : > { %1940 = dma.done.wait (!%p1550_p6), %s1296_s20, 8192  }
 0x26a   : > { %1942 = vsyncadd (!%p1550_p6), %s1296_s20, 4294959104  ;;  %s16_s19 = sadd.s32 1, %s1973_s19   ;;  %s2445_s12 = smov %s1949_s13 }
 0x26b   : > { %p13_p7 = scmp.ge.s32.totalorder %s16_s19, 10   ;;  %s2446_s13 = smov %s1953_s14 }
 0x26c   : > { %s2447_s14 = smov %s2069_s30  ;;  %s2448_s15 = smov %s1965_s17 }
 0x26d   : > { %s2449_s16 = smov %s1969_s18  ;;  %s2450_s17 = smov %s2453_s22 }
 0x26e   : > { %s2451_s18 = smov %s2457_s23  ;;  %15 = sbr.rel (!%p13_p7) target bundleno = 5 (0x5), region = 70 }
 0x275   :  { %1301 = vsyncpa [#allocation3], 1 }
 0x276   :  { %1303 = vsyncpa [#allocation3 + $0x1], 1 }

</bundles_post_ra>
